<compile_context>
chip_gen: v7x
topology: tpu7x:2x2x1
jax: 0.10.0
libtpu: 0.0.40
codegen_flags: <defaults>
</compile_context>

<pallas_src>
import math
from functools import partial

import numpy as np
import jax
import jax.numpy as jnp
from jax import lax
from jax.experimental import pallas as pl
from jax.experimental.pallas import tpu as pltpu


# ----------------------------------------------------------------------------
# Helpers
# ----------------------------------------------------------------------------
def _seq_tile(N):
    # Prefer 256-row Q tiles (pipelining + megacore with negligible per-step
    # overhead); fall back to the full sequence for small / odd N (a block that
    # equals the full array always satisfies the (8,128) rule).
    for t in (256, 512, 128):
        if N % t == 0:
            return t
    return N


def _erf(x):
    # Abramowitz & Stegun 7.1.26 (|err| < 1.5e-7); matches torch's exact GELU to f32.
    a1, a2, a3, a4, a5 = 0.254829592, -0.284496736, 1.421413741, -1.453152027, 1.061405429
    p = 0.3275911
    sgn = jnp.where(x >= 0, 1.0, -1.0)
    ax = jnp.abs(x)
    t = 1.0 / (1.0 + p * ax)
    poly = ((((a5 * t + a4) * t + a3) * t + a2) * t + a1) * t
    return sgn * (1.0 - poly * jnp.exp(-ax * ax))


def _gelu(x):
    return 0.5 * x * (1.0 + _erf(x * (1.0 / math.sqrt(2.0))))


def _ffn_residual_tail(x, xb, msg, w1a_ref, w1b_ref, b1_ref, g_ref, be_ref,
                       w2_ref, b2_ref, eps):
    """out = x + Linear2(GELU(LayerNorm(x @ W1a + msg @ W1b + b1))) (all row-wise)."""
    h1 = (jnp.dot(xb, w1a_ref[...], preferred_element_type=jnp.float32)
          + jnp.dot(msg.astype(jnp.bfloat16), w1b_ref[...],
                    preferred_element_type=jnp.float32)
          + b1_ref[...])
    mu = jnp.mean(h1, axis=-1, keepdims=True)
    var = jnp.mean((h1 - mu) ** 2, axis=-1, keepdims=True)
    hn = (h1 - mu) * lax.rsqrt(var + eps) * g_ref[...] + be_ref[...]
    hg = _gelu(hn).astype(jnp.bfloat16)
    return x + jnp.dot(hg, w2_ref[...], preferred_element_type=jnp.float32) + b2_ref[...]


# ----------------------------------------------------------------------------
# Fused SelfBlock kernel: grid = (B, N // TQ)
# ----------------------------------------------------------------------------
def _self_block_kernel(x_ref, cos_ref, sin_ref,
                       wq_ref, bq_ref, wkv_ref, bkv_ref, wo_ref, bo_ref,
                       w1a_ref, w1b_ref, b1_ref, g_ref, be_ref, w2_ref, b2_ref,
                       o_ref, kv_ref, *, H, hd, eps):
    D = H * hd
    half = hd // 2
    TQ = o_ref.shape[1]

    def rope(t, cos, sin):
        # de-interleaved head layout -> rotate_half is a half swap (sign folded in sin)
        swapped = jnp.concatenate([t[:, half:], t[:, :half]], axis=-1)
        return t * cos + swapped * sin

    # --- K/V cache for the whole sequence, built once per batch element (qi == 0) ---
    @pl.when(pl.program_id(1) == 0)
    def _():
        xf = x_ref[0].astype(jnp.bfloat16)
        kv = jnp.dot(xf, wkv_ref[...], preferred_element_type=jnp.float32) + bkv_ref[...]
        cosf = cos_ref[0]
        sinf = sin_ref[0]
        k_rot = jnp.concatenate(
            [rope(kv[:, h * hd:(h + 1) * hd], cosf, sinf) for h in range(H)], axis=-1)
        # single full-width (lane-dense) store of [K_rot | V] in bf16
        kv_ref[...] = jnp.concatenate([k_rot, kv[:, D:]], axis=-1).astype(jnp.bfloat16)

    # --- Q row tile (scale 1/sqrt(hd) pre-folded into wq / bq) ---
    r0 = pl.multiple_of(pl.program_id(1) * TQ, TQ)
    x = x_ref[0, pl.ds(r0, TQ), :]                       # [TQ, D] f32 (residual)
    cosq = cos_ref[0, pl.ds(r0, TQ), :]
    sinq = sin_ref[0, pl.ds(r0, TQ), :]
    xb = x.astype(jnp.bfloat16)
    qp = jnp.dot(xb, wq_ref[...], preferred_element_type=jnp.float32) + bq_ref[...]

    acc = jnp.zeros((TQ, D), jnp.float32)
    for h in range(H):                                   # static unroll, H is small
        q = rope(qp[:, h * hd:(h + 1) * hd], cosq, sinq).astype(jnp.bfloat16)
        k = kv_ref[:, h * hd:(h + 1) * hd]               # [N, hd] bf16
        v = kv_ref[:, D + h * hd:D + (h + 1) * hd]       # [N, hd] bf16
        s = lax.dot_general(q, k, (((1,), (1,)), ((), ())),
                            preferred_element_type=jnp.float32)          # [TQ, N]
        e = jnp.exp(s - jnp.max(s, axis=-1, keepdims=True))
        p = (e * pl.reciprocal(jnp.sum(e, axis=-1, keepdims=True), approx=True)
             ).astype(jnp.bfloat16)
        pv = jnp.dot(p, v, preferred_element_type=jnp.float32)           # [TQ, hd]
        acc = acc + jnp.dot(pv.astype(jnp.bfloat16), wo_ref[h],
                            preferred_element_type=jnp.float32)          # out-proj accum
    msg = acc + bo_ref[...]

    out = _ffn_residual_tail(x, xb, msg, w1a_ref, w1b_ref, b1_ref, g_ref, be_ref,
                             w2_ref, b2_ref, eps)
    o_ref[0] = out.astype(o_ref.dtype)


def self_block(x, enc, kp):
    """x: [B,N,D]; enc: [2,B,1,N,hd] (cos, sin).  Returns [B,N,D]."""
    B, N, D = x.shape
    H = kp["H"]
    hd = D // H
    # Rotary tables: de-interleave the head dim (even freqs first, odd second) and
    # fold the rotate_half sign into sin.  Tiny [B,N,hd] XLA ops, done once.
    cos = enc[0, :, 0]                                   # [B, N, hd]
    sin = enc[1, :, 0]
    cos_p = jnp.concatenate([cos[..., 0::2], cos[..., 1::2]], axis=-1)
    sin_p = jnp.concatenate([-sin[..., 0::2], sin[..., 1::2]], axis=-1)

    TQ = _seq_tile(N)
    f = kp["ffn"]
    kernel = partial(_self_block_kernel, H=H, hd=hd, eps=f["eps"])
    res = lambda b, q: (0, 0)                            # resident weights
    return pl.pallas_call(
        kernel,
        out_shape=jax.ShapeDtypeStruct((B, N, D), x.dtype),
        grid=(B, N // TQ),
        in_specs=[
            pl.BlockSpec((1, N, D), lambda b, q: (b, 0, 0)),      # x (queries + K/V src)
            pl.BlockSpec((1, N, hd), lambda b, q: (b, 0, 0)),     # cos
            pl.BlockSpec((1, N, hd), lambda b, q: (b, 0, 0)),     # sin (signed)
            pl.BlockSpec((D, D), res),                            # Wq  (bf16, scale folded)
            pl.BlockSpec((1, D), res),                            # bq
            pl.BlockSpec((D, 2 * D), res),                        # Wkv (bf16)
            pl.BlockSpec((1, 2 * D), res),                        # bkv
            pl.BlockSpec((H, hd, D), lambda b, q: (0, 0, 0)),     # Wo  (bf16, per-head)
            pl.BlockSpec((1, D), res),                            # bo
            pl.BlockSpec((D, 2 * D), res),                        # W1[:D]
            pl.BlockSpec((D, 2 * D), res),                        # W1[D:]
            pl.BlockSpec((1, 2 * D), res),                        # b1
            pl.BlockSpec((1, 2 * D), res),                        # LN gamma
            pl.BlockSpec((1, 2 * D), res),                        # LN beta
            pl.BlockSpec((2 * D, D), res),                        # W2
            pl.BlockSpec((1, D), res),                            # b2
        ],
        out_specs=pl.BlockSpec((1, TQ, D), lambda b, q: (b, q, 0)),
        scratch_shapes=[pltpu.VMEM((N, 2 * D), jnp.bfloat16)],    # [K_rot | V] cache
        compiler_params=pltpu.CompilerParams(
            dimension_semantics=("parallel", "arbitrary"),
            vmem_limit_bytes=64 * 1024 * 1024),
    )(x, cos_p, sin_p, kp["w_q"], kp["b_q"], kp["w_kv"], kp["b_kv"],
      kp["w_o"], kp["b_o"], f["w1a"], f["w1b"], f["b1"], f["g"], f["beta"],
      f["w2"], f["b2"])


# ----------------------------------------------------------------------------
# Fused CrossBlock kernel, one direction (query=xd, key/value=xs): grid = (B, Nd//TQ)
# ----------------------------------------------------------------------------
def _cross_block_kernel(xd_ref, xs_ref,
                        wqk_ref, bqk_ref, wv_ref, bv_ref, wout_ref, bout_ref,
                        w1a_ref, w1b_ref, b1_ref, g_ref, be_ref, w2_ref, b2_ref,
                        o_ref, kv_ref, *, H, hd, eps):
    D = H * hd
    TQ = o_ref.shape[1]

    # --- source-side qk (scaled) and v, built once per batch element ---
    @pl.when(pl.program_id(1) == 0)
    def _():
        xs = xs_ref[0].astype(jnp.bfloat16)
        qks = jnp.dot(xs, wqk_ref[...], preferred_element_type=jnp.float32) + bqk_ref[...]
        vs = jnp.dot(xs, wv_ref[...], preferred_element_type=jnp.float32) + bv_ref[...]
        kv_ref[...] = jnp.concatenate([qks, vs], axis=-1).astype(jnp.bfloat16)

    r0 = pl.multiple_of(pl.program_id(1) * TQ, TQ)
    x = xd_ref[0, pl.ds(r0, TQ), :]                      # [TQ, D] f32 (residual)
    xb = x.astype(jnp.bfloat16)
    qd = jnp.dot(xb, wqk_ref[...], preferred_element_type=jnp.float32) + bqk_ref[...]

    acc = jnp.zeros((TQ, D), jnp.float32)
    for h in range(H):
        q = qd[:, h * hd:(h + 1) * hd].astype(jnp.bfloat16)
        k = kv_ref[:, h * hd:(h + 1) * hd]
        v = kv_ref[:, D + h * hd:D + (h + 1) * hd]
        s = lax.dot_general(q, k, (((1,), (1,)), ((), ())),
                            preferred_element_type=jnp.float32)          # [TQ, Ns]
        e = jnp.exp(s - jnp.max(s, axis=-1, keepdims=True))
        p = (e * pl.reciprocal(jnp.sum(e, axis=-1, keepdims=True), approx=True)
             ).astype(jnp.bfloat16)
        pv = jnp.dot(p, v, preferred_element_type=jnp.float32)
        acc = acc + jnp.dot(pv.astype(jnp.bfloat16), wout_ref[h],
                            preferred_element_type=jnp.float32)
    msg = acc + bout_ref[...]

    out = _ffn_residual_tail(x, xb, msg, w1a_ref, w1b_ref, b1_ref, g_ref, be_ref,
                             w2_ref, b2_ref, eps)
    o_ref[0] = out.astype(o_ref.dtype)


def _cross_direction(xd, xs, kp):
    """Attention with queries from xd and keys/values from xs, + out proj + FFN + res."""
    B, Nd, D = xd.shape
    Ns = xs.shape[1]
    H = kp["H"]
    hd = D // H
    TQ = _seq_tile(Nd)
    f = kp["ffn"]
    kernel = partial(_cross_block_kernel, H=H, hd=hd, eps=f["eps"])
    res = lambda b, q: (0, 0)
    return pl.pallas_call(
        kernel,
        out_shape=jax.ShapeDtypeStruct((B, Nd, D), xd.dtype),
        grid=(B, Nd // TQ),
        in_specs=[
            pl.BlockSpec((1, Nd, D), lambda b, q: (b, 0, 0)),     # dst (queries+residual)
            pl.BlockSpec((1, Ns, D), lambda b, q: (b, 0, 0)),     # src (keys/values)
            pl.BlockSpec((D, D), res),                            # Wqk (bf16, sqrt-scale folded)
            pl.BlockSpec((1, D), res),
            pl.BlockSpec((D, D), res),                            # Wv
            pl.BlockSpec((1, D), res),
            pl.BlockSpec((H, hd, D), lambda b, q: (0, 0, 0)),     # Wout (per-head)
            pl.BlockSpec((1, D), res),
            pl.BlockSpec((D, 2 * D), res),                        # W1[:D]
            pl.BlockSpec((D, 2 * D), res),                        # W1[D:]
            pl.BlockSpec((1, 2 * D), res),
            pl.BlockSpec((1, 2 * D), res),
            pl.BlockSpec((1, 2 * D), res),
            pl.BlockSpec((2 * D, D), res),                        # W2
            pl.BlockSpec((1, D), res),
        ],
        out_specs=pl.BlockSpec((1, TQ, D), lambda b, q: (b, q, 0)),
        scratch_shapes=[pltpu.VMEM((Ns, 2 * D), jnp.bfloat16)],
        compiler_params=pltpu.CompilerParams(
            dimension_semantics=("parallel", "arbitrary"),
            vmem_limit_bytes=64 * 1024 * 1024),
    )(xd, xs, kp["w_qk"], kp["b_qk"], kp["w_v"], kp["b_v"], kp["w_out"], kp["b_out"],
      f["w1a"], f["w1b"], f["b1"], f["g"], f["beta"], f["w2"], f["b2"])


def cross_block(x0, x1, kp):
    y0 = _cross_direction(x0, x1, kp)   # softmax(sim, -1) direction
    y1 = _cross_direction(x1, x0, kp)   # softmax(sim,  0) direction == roles swapped
    return y0, y1


def transformer_layer(desc0, desc1, enc0, enc1, kparams):
    d0 = self_block(desc0, enc0, kparams["self"])
    d1 = self_block(desc1, enc1, kparams["self"])
    return cross_block(d0, d1, kparams["cross"])


# ----------------------------------------------------------------------------
# Parameters: reference-style init + one-time kernel-ready preparation
# ----------------------------------------------------------------------------
def init_params(key, D, H):
    keys = iter(jax.random.split(key, 32))

    def lin(din, dout):
        s = 1.0 / math.sqrt(din)
        w = jax.random.uniform(next(keys), (din, dout), jnp.float32, -s, s)
        b = jax.random.uniform(next(keys), (dout,), jnp.float32, -s, s)
        return w, b

    def ffn_params():
        w1, b1 = lin(2 * D, 2 * D)
        w2, b2 = lin(2 * D, D)
        return dict(w1=w1, b1=b1,
                    g=jnp.ones((2 * D,), jnp.float32),
                    beta=jnp.zeros((2 * D,), jnp.float32),
                    w2=w2, b2=b2, eps=1e-5)

    # SelfBlock: Wqkv Linear(D, 3D); torch column index = h*hd*3 + d*3 + {q,k,v}
    wqkv, bqkv = lin(D, 3 * D)
    wo, bo = lin(D, D)
    self_p = dict(
        H=H,
        wq=wqkv[:, 0::3], bq=bqkv[0::3],
        wk=wqkv[:, 1::3], bk=bqkv[1::3],
        wv=wqkv[:, 2::3], bv=bqkv[2::3],
        wo=wo, bo=bo, ffn=ffn_params(),
    )
    wqk, bqk = lin(D, D)
    wv_, bv_ = lin(D, D)
    wout, bout = lin(D, D)
    cross_p = dict(H=H, wqk=wqk, bqk=bqk, wv=wv_, bv=bv_,
                   wout=wout, bout=bout, ffn=ffn_params())
    return dict(self=self_p, cross=cross_p)


def prepare_kernel_params(params, D, H):
    """One-time weight prep: de-interleave q/k head dims (RoPE half-swap trick), fold
    the attention scale into the q / qk weights, reshape Wo/Wout to [H,hd,D] for the
    per-head out-proj accumulation, cast all matmul weights to bf16 (biases stay f32)."""
    hd = D // H
    idx = np.arange(D).reshape(H, hd)
    deint = np.concatenate([idx[:, 0::2], idx[:, 1::2]], axis=1).reshape(-1)
    bf = jnp.bfloat16

    def prep_ffn(f):
        return dict(w1a=f["w1"][:D].astype(bf), w1b=f["w1"][D:].astype(bf),
                    b1=f["b1"].reshape(1, 2 * D),
                    g=f["g"].reshape(1, 2 * D),
                    beta=f["beta"].reshape(1, 2 * D),
                    w2=f["w2"].astype(bf), b2=f["b2"].reshape(1, D), eps=f["eps"])

    sp = params["self"]
    scale = float(hd) ** -0.5
    self_k = dict(
        H=H,
        w_q=(sp["wq"][:, deint] * scale).astype(bf),
        b_q=(sp["bq"][deint] * scale).reshape(1, D),
        w_kv=jnp.concatenate([sp["wk"][:, deint], sp["wv"]], axis=1).astype(bf),
        b_kv=jnp.concatenate([sp["bk"][deint], sp["bv"]]).reshape(1, 2 * D),
        w_o=sp["wo"].reshape(H, hd, D).astype(bf),
        b_o=sp["bo"].reshape(1, D),
        ffn=prep_ffn(sp["ffn"]),
    )
    cp = params["cross"]
    sqs = float(hd) ** -0.25
    cross_k = dict(
        H=H,
        w_qk=(cp["wqk"] * sqs).astype(bf), b_qk=(cp["bqk"] * sqs).reshape(1, D),
        w_v=cp["wv"].astype(bf), b_v=cp["bv"].reshape(1, D),
        w_out=cp["wout"].reshape(H, hd, D).astype(bf), b_out=cp["bout"].reshape(1, D),
        ffn=prep_ffn(cp["ffn"]),
    )
    return dict(self=self_k, cross=cross_k)


# ----------------------------------------------------------------------------
# Pure-JAX reference (mirrors the PyTorch forward) for validation
# ----------------------------------------------------------------------------
def ref_rotate_half(x):
    x1 = x[..., 0::2]
    x2 = x[..., 1::2]
    return jnp.stack((-x2, x1), axis=-1).reshape(x.shape)


def ref_ffn(cat, p):
    h = cat @ p["w1"] + p["b1"]
    mu = jnp.mean(h, axis=-1, keepdims=True)
    var = jnp.mean((h - mu) ** 2, axis=-1, keepdims=True)
    hn = (h - mu) / jnp.sqrt(var + p["eps"]) * p["g"] + p["beta"]
    return jax.nn.gelu(hn, approximate=False) @ p["w2"] + p["b2"]


def ref_self_block(x, enc, p):
    B, N, D = x.shape
    H = p["H"]
    hd = D // H

    def proj(w, b):
        return (x.reshape(B * N, D) @ w + b).reshape(B, N, H, hd).transpose(0, 2, 1, 3)

    q, k, v = proj(p["wq"], p["bq"]), proj(p["wk"], p["bk"]), proj(p["wv"], p["bv"])
    cos, sin = enc[0], enc[1]                            # [B,1,N,hd]
    q = q * cos + ref_rotate_half(q) * sin
    k = k * cos + ref_rotate_half(k) * sin
    s = jnp.einsum("bhid,bhjd->bhij", q, k) / math.sqrt(hd)
    a = jax.nn.softmax(s, axis=-1)
    ctx = jnp.einsum("bhij,bhjd->bhid", a, v)
    msg = ctx.transpose(0, 2, 1, 3).reshape(B, N, D) @ p["wo"] + p["bo"]
    return x + ref_ffn(jnp.concatenate([x, msg], -1), p["ffn"])


def ref_cross_block(x0, x1, p):
    H = p["H"]
    D = x0.shape[-1]
    hd = D // H

    def proj(x, w, b):
        B, N, _ = x.shape
        return (x.reshape(B * N, D) @ w + b).reshape(B, N, H, hd).transpose(0, 2, 1, 3)

    sc = float(hd) ** -0.25
    qk0 = proj(x0, p["wqk"], p["bqk"]) * sc
    qk1 = proj(x1, p["wqk"], p["bqk"]) * sc
    v0 = proj(x0, p["wv"], p["bv"])
    v1 = proj(x1, p["wv"], p["bv"])
    sim = jnp.einsum("bhid,bhjd->bhij", qk0, qk1)
    a01 = jax.nn.softmax(sim, axis=-1)
    a10 = jax.nn.softmax(sim, axis=-2)
    m0 = jnp.einsum("bhij,bhjd->bhid", a01, v1)
    m1 = jnp.einsum("bhij,bhid->bhjd", a10, v0)
    B, N0, _ = x0.shape
    B, N1, _ = x1.shape
    m0 = m0.transpose(0, 2, 1, 3).reshape(B, N0, D) @ p["wout"] + p["bout"]
    m1 = m1.transpose(0, 2, 1, 3).reshape(B, N1, D) @ p["wout"] + p["bout"]
    y0 = x0 + ref_ffn(jnp.concatenate([x0, m0], -1), p["ffn"])
    y1 = x1 + ref_ffn(jnp.concatenate([x1, m1], -1), p["ffn"])
    return y0, y1


def ref_transformer_layer(d0, d1, e0, e1, params):
    d0 = ref_self_block(d0, e0, params["self"])
    d1 = ref_self_block(d1, e1, params["self"])
    return ref_cross_block(d0, d1, params["cross"])


# ----------------------------------------------------------------------------
if __name__ == "__main__":
    B, N, D, H = 2, 16, 32, 4
    hd = D // H

    key = jax.random.PRNGKey(0)
    k0, k1, kp = jax.random.split(key, 3)
    desc0 = jax.random.normal(k0, (B, N, D), jnp.float32)
    desc1 = jax.random.normal(k1, (B, N, D), jnp.float32)

    # Rotary position encoding [2, B, 1, N, hd]: interleaved (cos, sin) pairs.
    pos = jnp.arange(N, dtype=jnp.float32)
    inv_freq = 1.0 / (10000.0 ** (jnp.arange(0, hd, 2, dtype=jnp.float32) / hd))
    ang = pos[:, None] * inv_freq[None, :]               # [N, hd//2]
    cos = jnp.repeat(jnp.cos(ang), 2, axis=-1)           # [N, hd]
    sin = jnp.repeat(jnp.sin(ang), 2, axis=-1)
    enc = jnp.stack([cos, sin], 0)[:, None, None]        # [2,1,1,N,hd]
    encoding0 = jnp.broadcast_to(enc, (2, B, 1, N, hd))
    encoding1 = encoding0

    params = init_params(kp, D, H)
    kparams = prepare_kernel_params(params, D, H)

    out0, out1 = transformer_layer(desc0, desc1, encoding0, encoding1, kparams)
    jax.block_until_ready((out0, out1))

    r0, r1 = ref_transformer_layer(desc0, desc1, encoding0, encoding1, params)
    assert out0.shape == (B, N, D) and out1.shape == (B, N, D)

    # bf16 MXU operands + approx EUP reciprocal -> compare with a relative
    # Frobenius-norm gate (a real bug shows up as O(1) relative error).
    def _relerr(a, b):
        a = a.astype(jnp.float32)
        b = b.astype(jnp.float32)
        return float(jnp.linalg.norm(a - b) / (jnp.linalg.norm(b) + 1e-12))

    e0, e1 = _relerr(out0, r0), _relerr(out1, r1)
    assert e0 < 2e-2 and e1 < 2e-2, (e0, e1)
    print("KERNEL_OK")
</pallas_src>

<mosaic_0001>
module attributes {stable_mosaic.version = 11 : i64} {
  func.func @_self_block_kernel(%arg0: i32, %arg1: i32, %arg2: memref<1x16x32xf32, #tpu.memory_space<vmem>>, %arg3: memref<1x16x8xf32, #tpu.memory_space<vmem>>, %arg4: memref<1x16x8xf32, #tpu.memory_space<vmem>>, %arg5: memref<32x32xbf16, #tpu.memory_space<vmem>>, %arg6: memref<1x32xf32, #tpu.memory_space<vmem>>, %arg7: memref<32x64xbf16, #tpu.memory_space<vmem>>, %arg8: memref<1x64xf32, #tpu.memory_space<vmem>>, %arg9: memref<4x8x32xbf16, #tpu.memory_space<vmem>>, %arg10: memref<1x32xf32, #tpu.memory_space<vmem>>, %arg11: memref<32x64xbf16, #tpu.memory_space<vmem>>, %arg12: memref<32x64xbf16, #tpu.memory_space<vmem>>, %arg13: memref<1x64xf32, #tpu.memory_space<vmem>>, %arg14: memref<1x64xf32, #tpu.memory_space<vmem>>, %arg15: memref<1x64xf32, #tpu.memory_space<vmem>>, %arg16: memref<64x32xbf16, #tpu.memory_space<vmem>>, %arg17: memref<1x32xf32, #tpu.memory_space<vmem>>, %arg18: memref<1x16x32xf32, #tpu.memory_space<vmem>>, %arg19: memref<16x64xbf16, #tpu.memory_space<vmem>>) attributes {dimension_semantics = [#tpu.dimension_semantics<parallel>, #tpu.dimension_semantics<arbitrary>], iteration_bounds = array<i64: 2, 1>, scalar_prefetch = 0 : i64, scratch_operands = 1 : i64, tpu.core_type = #tpu.core_type<tc>, window_params = [{transform_indices = @transform_0, window_bounds = array<i64: 1, 16, 32>}, {transform_indices = @transform_1, window_bounds = array<i64: 1, 16, 8>}, {transform_indices = @transform_2, window_bounds = array<i64: 1, 16, 8>}, {pipeline_mode = #tpu.pipeline_mode<synchronous>, transform_indices = @transform_3, window_bounds = array<i64: 32, 32>}, {pipeline_mode = #tpu.pipeline_mode<synchronous>, transform_indices = @transform_4, window_bounds = array<i64: 1, 32>}, {pipeline_mode = #tpu.pipeline_mode<synchronous>, transform_indices = @transform_5, window_bounds = array<i64: 32, 64>}, {pipeline_mode = #tpu.pipeline_mode<synchronous>, transform_indices = @transform_6, window_bounds = array<i64: 1, 64>}, {pipeline_mode = #tpu.pipeline_mode<synchronous>, transform_indices = @transform_7, window_bounds = array<i64: 4, 8, 32>}, {pipeline_mode = #tpu.pipeline_mode<synchronous>, transform_indices = @transform_8, window_bounds = array<i64: 1, 32>}, {pipeline_mode = #tpu.pipeline_mode<synchronous>, transform_indices = @transform_9, window_bounds = array<i64: 32, 64>}, {pipeline_mode = #tpu.pipeline_mode<synchronous>, transform_indices = @transform_10, window_bounds = array<i64: 32, 64>}, {pipeline_mode = #tpu.pipeline_mode<synchronous>, transform_indices = @transform_11, window_bounds = array<i64: 1, 64>}, {pipeline_mode = #tpu.pipeline_mode<synchronous>, transform_indices = @transform_12, window_bounds = array<i64: 1, 64>}, {pipeline_mode = #tpu.pipeline_mode<synchronous>, transform_indices = @transform_13, window_bounds = array<i64: 1, 64>}, {pipeline_mode = #tpu.pipeline_mode<synchronous>, transform_indices = @transform_14, window_bounds = array<i64: 64, 32>}, {pipeline_mode = #tpu.pipeline_mode<synchronous>, transform_indices = @transform_15, window_bounds = array<i64: 1, 32>}, {transform_indices = @transform_16, window_bounds = array<i64: 1, 16, 32>}]} {
    %c0_i32 = arith.constant 0 : i32
    %0 = arith.cmpi eq, %arg1, %c0_i32 : i32
    %1 = arith.extui %0 : i1 to i32
    %c0_i32_0 = arith.constant 0 : i32
    %2 = arith.cmpi ne, %1, %c0_i32_0 : i32
    scf.if %2 {
      %c0_92 = arith.constant 0 : index
      %c0_93 = arith.constant 0 : index
      %c0_94 = arith.constant 0 : index
      %220 = vector.load %arg2[%c0_92, %c0_93, %c0_94] : memref<1x16x32xf32, #tpu.memory_space<vmem>>, vector<1x16x32xf32>
      %221 = vector.shape_cast %220 : vector<1x16x32xf32> to vector<16x32xf32>
      %222 = arith.truncf %221 : vector<16x32xf32> to vector<16x32xbf16>
      %c0_95 = arith.constant 0 : index
      %c0_96 = arith.constant 0 : index
      %223 = vector.load %arg7[%c0_95, %c0_96] : memref<32x64xbf16, #tpu.memory_space<vmem>>, vector<32x64xbf16>
      %cst_97 = arith.constant dense<0.000000e+00> : vector<16x64xf32>
      %224 = tpu.matmul %222, %223, %cst_97 {dimension_numbers = #tpu.dot_dimension_numbers<[1], [0], [0], [1], [0, 0, 1, 1], [], []>} : vector<16x32xbf16>, vector<32x64xbf16>, vector<16x64xf32> -> vector<16x64xf32>
      %c0_98 = arith.constant 0 : index
      %c0_99 = arith.constant 0 : index
      %225 = vector.load %arg8[%c0_98, %c0_99] : memref<1x64xf32, #tpu.memory_space<vmem>>, vector<1x64xf32>
      %226 = vector.broadcast %225 : vector<1x64xf32> to vector<16x64xf32>
      %227 = arith.addf %224, %226 : vector<16x64xf32>
      %c0_100 = arith.constant 0 : index
      %c0_101 = arith.constant 0 : index
      %c0_102 = arith.constant 0 : index
      %228 = vector.load %arg3[%c0_100, %c0_101, %c0_102] : memref<1x16x8xf32, #tpu.memory_space<vmem>>, vector<1x16x8xf32>
      %229 = vector.shape_cast %228 : vector<1x16x8xf32> to vector<16x8xf32>
      %c0_103 = arith.constant 0 : index
      %c0_104 = arith.constant 0 : index
      %c0_105 = arith.constant 0 : index
      %230 = vector.load %arg4[%c0_103, %c0_104, %c0_105] : memref<1x16x8xf32, #tpu.memory_space<vmem>>, vector<1x16x8xf32>
      %231 = vector.shape_cast %230 : vector<1x16x8xf32> to vector<16x8xf32>
      %232 = vector.extract_strided_slice %227 {offsets = [0, 0], sizes = [16, 8], strides = [1, 1]} : vector<16x64xf32> to vector<16x8xf32>
      %233 = vector.extract_strided_slice %232 {offsets = [0, 4], sizes = [16, 4], strides = [1, 1]} : vector<16x8xf32> to vector<16x4xf32>
      %234 = vector.extract_strided_slice %232 {offsets = [0, 0], sizes = [16, 4], strides = [1, 1]} : vector<16x8xf32> to vector<16x4xf32>
      %235 = tpu.concatenate %233, %234 in 1 : vector<16x4xf32>, vector<16x4xf32> -> vector<16x8xf32>
      %236 = arith.mulf %232, %229 : vector<16x8xf32>
      %237 = arith.mulf %235, %231 : vector<16x8xf32>
      %238 = arith.addf %236, %237 : vector<16x8xf32>
      %239 = vector.extract_strided_slice %227 {offsets = [0, 8], sizes = [16, 8], strides = [1, 1]} : vector<16x64xf32> to vector<16x8xf32>
      %240 = vector.extract_strided_slice %239 {offsets = [0, 4], sizes = [16, 4], strides = [1, 1]} : vector<16x8xf32> to vector<16x4xf32>
      %241 = vector.extract_strided_slice %239 {offsets = [0, 0], sizes = [16, 4], strides = [1, 1]} : vector<16x8xf32> to vector<16x4xf32>
      %242 = tpu.concatenate %240, %241 in 1 : vector<16x4xf32>, vector<16x4xf32> -> vector<16x8xf32>
      %243 = arith.mulf %239, %229 : vector<16x8xf32>
      %244 = arith.mulf %242, %231 : vector<16x8xf32>
      %245 = arith.addf %243, %244 : vector<16x8xf32>
      %246 = vector.extract_strided_slice %227 {offsets = [0, 16], sizes = [16, 8], strides = [1, 1]} : vector<16x64xf32> to vector<16x8xf32>
      %247 = vector.extract_strided_slice %246 {offsets = [0, 4], sizes = [16, 4], strides = [1, 1]} : vector<16x8xf32> to vector<16x4xf32>
      %248 = vector.extract_strided_slice %246 {offsets = [0, 0], sizes = [16, 4], strides = [1, 1]} : vector<16x8xf32> to vector<16x4xf32>
      %249 = tpu.concatenate %247, %248 in 1 : vector<16x4xf32>, vector<16x4xf32> -> vector<16x8xf32>
      %250 = arith.mulf %246, %229 : vector<16x8xf32>
      %251 = arith.mulf %249, %231 : vector<16x8xf32>
      %252 = arith.addf %250, %251 : vector<16x8xf32>
      %253 = vector.extract_strided_slice %227 {offsets = [0, 24], sizes = [16, 8], strides = [1, 1]} : vector<16x64xf32> to vector<16x8xf32>
      %254 = vector.extract_strided_slice %253 {offsets = [0, 4], sizes = [16, 4], strides = [1, 1]} : vector<16x8xf32> to vector<16x4xf32>
      %255 = vector.extract_strided_slice %253 {offsets = [0, 0], sizes = [16, 4], strides = [1, 1]} : vector<16x8xf32> to vector<16x4xf32>
      %256 = tpu.concatenate %254, %255 in 1 : vector<16x4xf32>, vector<16x4xf32> -> vector<16x8xf32>
      %257 = arith.mulf %253, %229 : vector<16x8xf32>
      %258 = arith.mulf %256, %231 : vector<16x8xf32>
      %259 = arith.addf %257, %258 : vector<16x8xf32>
      %260 = tpu.concatenate %238, %245, %252, %259 in 1 : vector<16x8xf32>, vector<16x8xf32>, vector<16x8xf32>, vector<16x8xf32> -> vector<16x32xf32>
      %261 = vector.extract_strided_slice %227 {offsets = [0, 32], sizes = [16, 32], strides = [1, 1]} : vector<16x64xf32> to vector<16x32xf32>
      %262 = tpu.concatenate %260, %261 in 1 : vector<16x32xf32>, vector<16x32xf32> -> vector<16x64xf32>
      %263 = arith.truncf %262 : vector<16x64xf32> to vector<16x64xbf16>
      %c0_106 = arith.constant 0 : index
      %c0_107 = arith.constant 0 : index
      %264 = vector.load %arg19[%c0_106, %c0_107] : memref<16x64xbf16, #tpu.memory_space<vmem>>, vector<16x64xbf16>
      tpu.vector_store %arg19[%c0_106, %c0_107], %263 {strides = array<i32>} : memref<16x64xbf16, #tpu.memory_space<vmem>>, vector<16x64xbf16>,
    } else {
    }
    %c16_i32 = arith.constant 16 : i32
    %3 = arith.muli %arg1, %c16_i32 : i32
    %4 = tpu.assume_multiple %3, 16 : i32
    %c0 = arith.constant 0 : index
    %5 = arith.index_cast %4 : i32 to index
    %c0_1 = arith.constant 0 : index
    %6 = vector.load %arg2[%c0, %5, %c0_1] : memref<1x16x32xf32, #tpu.memory_space<vmem>>, vector<1x16x32xf32>
    %7 = vector.shape_cast %6 : vector<1x16x32xf32> to vector<16x32xf32>
    %c0_2 = arith.constant 0 : index
    %8 = arith.index_cast %4 : i32 to index
    %c0_3 = arith.constant 0 : index
    %9 = vector.load %arg3[%c0_2, %8, %c0_3] : memref<1x16x8xf32, #tpu.memory_space<vmem>>, vector<1x16x8xf32>
    %10 = vector.shape_cast %9 : vector<1x16x8xf32> to vector<16x8xf32>
    %c0_4 = arith.constant 0 : index
    %11 = arith.index_cast %4 : i32 to index
    %c0_5 = arith.constant 0 : index
    %12 = vector.load %arg4[%c0_4, %11, %c0_5] : memref<1x16x8xf32, #tpu.memory_space<vmem>>, vector<1x16x8xf32>
    %13 = vector.shape_cast %12 : vector<1x16x8xf32> to vector<16x8xf32>
    %14 = arith.truncf %7 : vector<16x32xf32> to vector<16x32xbf16>
    %c0_6 = arith.constant 0 : index
    %c0_7 = arith.constant 0 : index
    %15 = vector.load %arg5[%c0_6, %c0_7] : memref<32x32xbf16, #tpu.memory_space<vmem>>, vector<32x32xbf16>
    %cst = arith.constant dense<0.000000e+00> : vector<16x32xf32>
    %16 = tpu.matmul %14, %15, %cst {dimension_numbers = #tpu.dot_dimension_numbers<[1], [0], [0], [1], [0, 0, 1, 1], [], []>} : vector<16x32xbf16>, vector<32x32xbf16>, vector<16x32xf32> -> vector<16x32xf32>
    %c0_8 = arith.constant 0 : index
    %c0_9 = arith.constant 0 : index
    %17 = vector.load %arg6[%c0_8, %c0_9] : memref<1x32xf32, #tpu.memory_space<vmem>>, vector<1x32xf32>
    %18 = vector.broadcast %17 : vector<1x32xf32> to vector<16x32xf32>
    %19 = arith.addf %16, %18 : vector<16x32xf32>
    %cst_10 = arith.constant 0.000000e+00 : f32
    %20 = vector.broadcast %cst_10 : f32 to vector<16x32xf32>
    %21 = vector.extract_strided_slice %19 {offsets = [0, 0], sizes = [16, 8], strides = [1, 1]} : vector<16x32xf32> to vector<16x8xf32>
    %22 = vector.extract_strided_slice %21 {offsets = [0, 4], sizes = [16, 4], strides = [1, 1]} : vector<16x8xf32> to vector<16x4xf32>
    %23 = vector.extract_strided_slice %21 {offsets = [0, 0], sizes = [16, 4], strides = [1, 1]} : vector<16x8xf32> to vector<16x4xf32>
    %24 = tpu.concatenate %22, %23 in 1 : vector<16x4xf32>, vector<16x4xf32> -> vector<16x8xf32>
    %25 = arith.mulf %21, %10 : vector<16x8xf32>
    %26 = arith.mulf %24, %13 : vector<16x8xf32>
    %27 = arith.addf %25, %26 : vector<16x8xf32>
    %28 = arith.truncf %27 : vector<16x8xf32> to vector<16x8xbf16>
    %c0_11 = arith.constant 0 : index
    %c0_12 = arith.constant 0 : index
    %29 = vector.load %arg19[%c0_11, %c0_12] : memref<16x64xbf16, #tpu.memory_space<vmem>>, vector<16x8xbf16>
    %c0_13 = arith.constant 0 : index
    %c32 = arith.constant 32 : index
    %30 = vector.load %arg19[%c0_13, %c32] : memref<16x64xbf16, #tpu.memory_space<vmem>>, vector<16x8xbf16>
    %cst_14 = arith.constant dense<0.000000e+00> : vector<16x16xf32>
    %31 = tpu.matmul %28, %29, %cst_14 {dimension_numbers = #tpu.dot_dimension_numbers<[1], [1], [0], [0], [0, 0, 1, 0], [], []>} : vector<16x8xbf16>, vector<16x8xbf16>, vector<16x16xf32> -> vector<16x16xf32>
    %cst_15 = arith.constant dense<0xFF800000> : vector<16xf32>
    %32 = vector.multi_reduction <maximumf>, %31, %cst_15 [1] : vector<16x16xf32> to vector<16xf32>
    %33 = vector.shape_cast %32 : vector<16xf32> to vector<16x1xf32>
    %34 = vector.broadcast %33 : vector<16x1xf32> to vector<16x16xf32>
    %35 = arith.subf %31, %34 : vector<16x16xf32>
    %36 = math.exp %35 : vector<16x16xf32>
    %cst_16 = arith.constant dense<0.000000e+00> : vector<16xf32>
    %37 = vector.multi_reduction <add>, %36, %cst_16 [1] : vector<16x16xf32> to vector<16xf32>
    %38 = vector.shape_cast %37 : vector<16xf32> to vector<16x1xf32>
    %39 = tpu.reciprocal %38 {approx = true} : vector<16x1xf32> -> vector<16x1xf32>
    %40 = vector.broadcast %39 : vector<16x1xf32> to vector<16x16xf32>
    %41 = arith.mulf %36, %40 : vector<16x16xf32>
    %42 = arith.truncf %41 : vector<16x16xf32> to vector<16x16xbf16>
    %cst_17 = arith.constant dense<0.000000e+00> : vector<16x8xf32>
    %43 = tpu.matmul %42, %30, %cst_17 {dimension_numbers = #tpu.dot_dimension_numbers<[1], [0], [0], [1], [0, 0, 1, 1], [], []>} : vector<16x16xbf16>, vector<16x8xbf16>, vector<16x8xf32> -> vector<16x8xf32>
    %44 = arith.truncf %43 : vector<16x8xf32> to vector<16x8xbf16>
    %c0_18 = arith.constant 0 : index
    %c0_19 = arith.constant 0 : index
    %c0_20 = arith.constant 0 : index
    %45 = vector.load %arg9[%c0_18, %c0_19, %c0_20] : memref<4x8x32xbf16, #tpu.memory_space<vmem>>, vector<1x8x32xbf16>
    %46 = vector.shape_cast %45 : vector<1x8x32xbf16> to vector<8x32xbf16>
    %cst_21 = arith.constant dense<0.000000e+00> : vector<16x32xf32>
    %47 = tpu.matmul %44, %46, %cst_21 {dimension_numbers = #tpu.dot_dimension_numbers<[1], [0], [0], [1], [0, 0, 1, 1], [], []>} : vector<16x8xbf16>, vector<8x32xbf16>, vector<16x32xf32> -> vector<16x32xf32>
    %48 = arith.addf %20, %47 : vector<16x32xf32>
    %49 = vector.extract_strided_slice %19 {offsets = [0, 8], sizes = [16, 8], strides = [1, 1]} : vector<16x32xf32> to vector<16x8xf32>
    %50 = vector.extract_strided_slice %49 {offsets = [0, 4], sizes = [16, 4], strides = [1, 1]} : vector<16x8xf32> to vector<16x4xf32>
    %51 = vector.extract_strided_slice %49 {offsets = [0, 0], sizes = [16, 4], strides = [1, 1]} : vector<16x8xf32> to vector<16x4xf32>
    %52 = tpu.concatenate %50, %51 in 1 : vector<16x4xf32>, vector<16x4xf32> -> vector<16x8xf32>
    %53 = arith.mulf %49, %10 : vector<16x8xf32>
    %54 = arith.mulf %52, %13 : vector<16x8xf32>
    %55 = arith.addf %53, %54 : vector<16x8xf32>
    %56 = arith.truncf %55 : vector<16x8xf32> to vector<16x8xbf16>
    %c0_22 = arith.constant 0 : index
    %c8 = arith.constant 8 : index
    %57 = vector.load %arg19[%c0_22, %c8] : memref<16x64xbf16, #tpu.memory_space<vmem>>, vector<16x8xbf16>
    %c0_23 = arith.constant 0 : index
    %c40 = arith.constant 40 : index
    %58 = vector.load %arg19[%c0_23, %c40] : memref<16x64xbf16, #tpu.memory_space<vmem>>, vector<16x8xbf16>
    %cst_24 = arith.constant dense<0.000000e+00> : vector<16x16xf32>
    %59 = tpu.matmul %56, %57, %cst_24 {dimension_numbers = #tpu.dot_dimension_numbers<[1], [1], [0], [0], [0, 0, 1, 0], [], []>} : vector<16x8xbf16>, vector<16x8xbf16>, vector<16x16xf32> -> vector<16x16xf32>
    %cst_25 = arith.constant dense<0xFF800000> : vector<16xf32>
    %60 = vector.multi_reduction <maximumf>, %59, %cst_25 [1] : vector<16x16xf32> to vector<16xf32>
    %61 = vector.shape_cast %60 : vector<16xf32> to vector<16x1xf32>
    %62 = vector.broadcast %61 : vector<16x1xf32> to vector<16x16xf32>
    %63 = arith.subf %59, %62 : vector<16x16xf32>
    %64 = math.exp %63 : vector<16x16xf32>
    %cst_26 = arith.constant dense<0.000000e+00> : vector<16xf32>
    %65 = vector.multi_reduction <add>, %64, %cst_26 [1] : vector<16x16xf32> to vector<16xf32>
    %66 = vector.shape_cast %65 : vector<16xf32> to vector<16x1xf32>
    %67 = tpu.reciprocal %66 {approx = true} : vector<16x1xf32> -> vector<16x1xf32>
    %68 = vector.broadcast %67 : vector<16x1xf32> to vector<16x16xf32>
    %69 = arith.mulf %64, %68 : vector<16x16xf32>
    %70 = arith.truncf %69 : vector<16x16xf32> to vector<16x16xbf16>
    %cst_27 = arith.constant dense<0.000000e+00> : vector<16x8xf32>
    %71 = tpu.matmul %70, %58, %cst_27 {dimension_numbers = #tpu.dot_dimension_numbers<[1], [0], [0], [1], [0, 0, 1, 1], [], []>} : vector<16x16xbf16>, vector<16x8xbf16>, vector<16x8xf32> -> vector<16x8xf32>
    %72 = arith.truncf %71 : vector<16x8xf32> to vector<16x8xbf16>
    %c1 = arith.constant 1 : index
    %c0_28 = arith.constant 0 : index
    %c0_29 = arith.constant 0 : index
    %73 = vector.load %arg9[%c1, %c0_28, %c0_29] : memref<4x8x32xbf16, #tpu.memory_space<vmem>>, vector<1x8x32xbf16>
    %74 = vector.shape_cast %73 : vector<1x8x32xbf16> to vector<8x32xbf16>
    %cst_30 = arith.constant dense<0.000000e+00> : vector<16x32xf32>
    %75 = tpu.matmul %72, %74, %cst_30 {dimension_numbers = #tpu.dot_dimension_numbers<[1], [0], [0], [1], [0, 0, 1, 1], [], []>} : vector<16x8xbf16>, vector<8x32xbf16>, vector<16x32xf32> -> vector<16x32xf32>
    %76 = arith.addf %48, %75 : vector<16x32xf32>
    %77 = vector.extract_strided_slice %19 {offsets = [0, 16], sizes = [16, 8], strides = [1, 1]} : vector<16x32xf32> to vector<16x8xf32>
    %78 = vector.extract_strided_slice %77 {offsets = [0, 4], sizes = [16, 4], strides = [1, 1]} : vector<16x8xf32> to vector<16x4xf32>
    %79 = vector.extract_strided_slice %77 {offsets = [0, 0], sizes = [16, 4], strides = [1, 1]} : vector<16x8xf32> to vector<16x4xf32>
    %80 = tpu.concatenate %78, %79 in 1 : vector<16x4xf32>, vector<16x4xf32> -> vector<16x8xf32>
    %81 = arith.mulf %77, %10 : vector<16x8xf32>
    %82 = arith.mulf %80, %13 : vector<16x8xf32>
    %83 = arith.addf %81, %82 : vector<16x8xf32>
    %84 = arith.truncf %83 : vector<16x8xf32> to vector<16x8xbf16>
    %c0_31 = arith.constant 0 : index
    %c16 = arith.constant 16 : index
    %85 = vector.load %arg19[%c0_31, %c16] : memref<16x64xbf16, #tpu.memory_space<vmem>>, vector<16x8xbf16>
    %c0_32 = arith.constant 0 : index
    %c48 = arith.constant 48 : index
    %86 = vector.load %arg19[%c0_32, %c48] : memref<16x64xbf16, #tpu.memory_space<vmem>>, vector<16x8xbf16>
    %cst_33 = arith.constant dense<0.000000e+00> : vector<16x16xf32>
    %87 = tpu.matmul %84, %85, %cst_33 {dimension_numbers = #tpu.dot_dimension_numbers<[1], [1], [0], [0], [0, 0, 1, 0], [], []>} : vector<16x8xbf16>, vector<16x8xbf16>, vector<16x16xf32> -> vector<16x16xf32>
    %cst_34 = arith.constant dense<0xFF800000> : vector<16xf32>
    %88 = vector.multi_reduction <maximumf>, %87, %cst_34 [1] : vector<16x16xf32> to vector<16xf32>
    %89 = vector.shape_cast %88 : vector<16xf32> to vector<16x1xf32>
    %90 = vector.broadcast %89 : vector<16x1xf32> to vector<16x16xf32>
    %91 = arith.subf %87, %90 : vector<16x16xf32>
    %92 = math.exp %91 : vector<16x16xf32>
    %cst_35 = arith.constant dense<0.000000e+00> : vector<16xf32>
    %93 = vector.multi_reduction <add>, %92, %cst_35 [1] : vector<16x16xf32> to vector<16xf32>
    %94 = vector.shape_cast %93 : vector<16xf32> to vector<16x1xf32>
    %95 = tpu.reciprocal %94 {approx = true} : vector<16x1xf32> -> vector<16x1xf32>
    %96 = vector.broadcast %95 : vector<16x1xf32> to vector<16x16xf32>
    %97 = arith.mulf %92, %96 : vector<16x16xf32>
    %98 = arith.truncf %97 : vector<16x16xf32> to vector<16x16xbf16>
    %cst_36 = arith.constant dense<0.000000e+00> : vector<16x8xf32>
    %99 = tpu.matmul %98, %86, %cst_36 {dimension_numbers = #tpu.dot_dimension_numbers<[1], [0], [0], [1], [0, 0, 1, 1], [], []>} : vector<16x16xbf16>, vector<16x8xbf16>, vector<16x8xf32> -> vector<16x8xf32>
    %100 = arith.truncf %99 : vector<16x8xf32> to vector<16x8xbf16>
    %c2 = arith.constant 2 : index
    %c0_37 = arith.constant 0 : index
    %c0_38 = arith.constant 0 : index
    %101 = vector.load %arg9[%c2, %c0_37, %c0_38] : memref<4x8x32xbf16, #tpu.memory_space<vmem>>, vector<1x8x32xbf16>
    %102 = vector.shape_cast %101 : vector<1x8x32xbf16> to vector<8x32xbf16>
    %cst_39 = arith.constant dense<0.000000e+00> : vector<16x32xf32>
    %103 = tpu.matmul %100, %102, %cst_39 {dimension_numbers = #tpu.dot_dimension_numbers<[1], [0], [0], [1], [0, 0, 1, 1], [], []>} : vector<16x8xbf16>, vector<8x32xbf16>, vector<16x32xf32> -> vector<16x32xf32>
    %104 = arith.addf %76, %103 : vector<16x32xf32>
    %105 = vector.extract_strided_slice %19 {offsets = [0, 24], sizes = [16, 8], strides = [1, 1]} : vector<16x32xf32> to vector<16x8xf32>
    %106 = vector.extract_strided_slice %105 {offsets = [0, 4], sizes = [16, 4], strides = [1, 1]} : vector<16x8xf32> to vector<16x4xf32>
    %107 = vector.extract_strided_slice %105 {offsets = [0, 0], sizes = [16, 4], strides = [1, 1]} : vector<16x8xf32> to vector<16x4xf32>
    %108 = tpu.concatenate %106, %107 in 1 : vector<16x4xf32>, vector<16x4xf32> -> vector<16x8xf32>
    %109 = arith.mulf %105, %10 : vector<16x8xf32>
    %110 = arith.mulf %108, %13 : vector<16x8xf32>
    %111 = arith.addf %109, %110 : vector<16x8xf32>
    %112 = arith.truncf %111 : vector<16x8xf32> to vector<16x8xbf16>
    %c0_40 = arith.constant 0 : index
    %c24 = arith.constant 24 : index
    %113 = vector.load %arg19[%c0_40, %c24] : memref<16x64xbf16, #tpu.memory_space<vmem>>, vector<16x8xbf16>
    %c0_41 = arith.constant 0 : index
    %c56 = arith.constant 56 : index
    %114 = vector.load %arg19[%c0_41, %c56] : memref<16x64xbf16, #tpu.memory_space<vmem>>, vector<16x8xbf16>
    %cst_42 = arith.constant dense<0.000000e+00> : vector<16x16xf32>
    %115 = tpu.matmul %112, %113, %cst_42 {dimension_numbers = #tpu.dot_dimension_numbers<[1], [1], [0], [0], [0, 0, 1, 0], [], []>} : vector<16x8xbf16>, vector<16x8xbf16>, vector<16x16xf32> -> vector<16x16xf32>
    %cst_43 = arith.constant dense<0xFF800000> : vector<16xf32>
    %116 = vector.multi_reduction <maximumf>, %115, %cst_43 [1] : vector<16x16xf32> to vector<16xf32>
    %117 = vector.shape_cast %116 : vector<16xf32> to vector<16x1xf32>
    %118 = vector.broadcast %117 : vector<16x1xf32> to vector<16x16xf32>
    %119 = arith.subf %115, %118 : vector<16x16xf32>
    %120 = math.exp %119 : vector<16x16xf32>
    %cst_44 = arith.constant dense<0.000000e+00> : vector<16xf32>
    %121 = vector.multi_reduction <add>, %120, %cst_44 [1] : vector<16x16xf32> to vector<16xf32>
    %122 = vector.shape_cast %121 : vector<16xf32> to vector<16x1xf32>
    %123 = tpu.reciprocal %122 {approx = true} : vector<16x1xf32> -> vector<16x1xf32>
    %124 = vector.broadcast %123 : vector<16x1xf32> to vector<16x16xf32>
    %125 = arith.mulf %120, %124 : vector<16x16xf32>
    %126 = arith.truncf %125 : vector<16x16xf32> to vector<16x16xbf16>
    %cst_45 = arith.constant dense<0.000000e+00> : vector<16x8xf32>
    %127 = tpu.matmul %126, %114, %cst_45 {dimension_numbers = #tpu.dot_dimension_numbers<[1], [0], [0], [1], [0, 0, 1, 1], [], []>} : vector<16x16xbf16>, vector<16x8xbf16>, vector<16x8xf32> -> vector<16x8xf32>
    %128 = arith.truncf %127 : vector<16x8xf32> to vector<16x8xbf16>
    %c3 = arith.constant 3 : index
    %c0_46 = arith.constant 0 : index
    %c0_47 = arith.constant 0 : index
    %129 = vector.load %arg9[%c3, %c0_46, %c0_47] : memref<4x8x32xbf16, #tpu.memory_space<vmem>>, vector<1x8x32xbf16>
    %130 = vector.shape_cast %129 : vector<1x8x32xbf16> to vector<8x32xbf16>
    %cst_48 = arith.constant dense<0.000000e+00> : vector<16x32xf32>
    %131 = tpu.matmul %128, %130, %cst_48 {dimension_numbers = #tpu.dot_dimension_numbers<[1], [0], [0], [1], [0, 0, 1, 1], [], []>} : vector<16x8xbf16>, vector<8x32xbf16>, vector<16x32xf32> -> vector<16x32xf32>
    %132 = arith.addf %104, %131 : vector<16x32xf32>
    %c0_49 = arith.constant 0 : index
    %c0_50 = arith.constant 0 : index
    %133 = vector.load %arg10[%c0_49, %c0_50] : memref<1x32xf32, #tpu.memory_space<vmem>>, vector<1x32xf32>
    %134 = vector.broadcast %133 : vector<1x32xf32> to vector<16x32xf32>
    %135 = arith.addf %132, %134 : vector<16x32xf32>
    %c0_51 = arith.constant 0 : index
    %c0_52 = arith.constant 0 : index
    %136 = vector.load %arg11[%c0_51, %c0_52] : memref<32x64xbf16, #tpu.memory_space<vmem>>, vector<32x64xbf16>
    %cst_53 = arith.constant dense<0.000000e+00> : vector<16x64xf32>
    %137 = tpu.matmul %14, %136, %cst_53 {dimension_numbers = #tpu.dot_dimension_numbers<[1], [0], [0], [1], [0, 0, 1, 1], [], []>} : vector<16x32xbf16>, vector<32x64xbf16>, vector<16x64xf32> -> vector<16x64xf32>
    %138 = arith.truncf %135 : vector<16x32xf32> to vector<16x32xbf16>
    %c0_54 = arith.constant 0 : index
    %c0_55 = arith.constant 0 : index
    %139 = vector.load %arg12[%c0_54, %c0_55] : memref<32x64xbf16, #tpu.memory_space<vmem>>, vector<32x64xbf16>
    %cst_56 = arith.constant dense<0.000000e+00> : vector<16x64xf32>
    %140 = tpu.matmul %138, %139, %cst_56 {dimension_numbers = #tpu.dot_dimension_numbers<[1], [0], [0], [1], [0, 0, 1, 1], [], []>} : vector<16x32xbf16>, vector<32x64xbf16>, vector<16x64xf32> -> vector<16x64xf32>
    %141 = arith.addf %137, %140 : vector<16x64xf32>
    %c0_57 = arith.constant 0 : index
    %c0_58 = arith.constant 0 : index
    %142 = vector.load %arg13[%c0_57, %c0_58] : memref<1x64xf32, #tpu.memory_space<vmem>>, vector<1x64xf32>
    %143 = vector.broadcast %142 : vector<1x64xf32> to vector<16x64xf32>
    %144 = arith.addf %141, %143 : vector<16x64xf32>
    %cst_59 = arith.constant dense<0.000000e+00> : vector<16xf32>
    %145 = vector.multi_reduction <add>, %144, %cst_59 [1] : vector<16x64xf32> to vector<16xf32>
    %146 = vector.shape_cast %145 : vector<16xf32> to vector<16x1xf32>
    %cst_60 = arith.constant 6.400000e+01 : f32
    %147 = vector.broadcast %cst_60 : f32 to vector<16x1xf32>
    %148 = arith.divf %146, %147 : vector<16x1xf32>
    %149 = vector.broadcast %148 : vector<16x1xf32> to vector<16x64xf32>
    %150 = arith.subf %144, %149 : vector<16x64xf32>
    %151 = arith.mulf %150, %150 : vector<16x64xf32>
    %cst_61 = arith.constant dense<0.000000e+00> : vector<16xf32>
    %152 = vector.multi_reduction <add>, %151, %cst_61 [1] : vector<16x64xf32> to vector<16xf32>
    %153 = vector.shape_cast %152 : vector<16xf32> to vector<16x1xf32>
    %cst_62 = arith.constant 6.400000e+01 : f32
    %154 = vector.broadcast %cst_62 : f32 to vector<16x1xf32>
    %155 = arith.divf %153, %154 : vector<16x1xf32>
    %156 = vector.broadcast %148 : vector<16x1xf32> to vector<16x64xf32>
    %157 = arith.subf %144, %156 : vector<16x64xf32>
    %cst_63 = arith.constant 9.99999974E-6 : f32
    %158 = vector.broadcast %cst_63 : f32 to vector<16x1xf32>
    %159 = arith.addf %155, %158 : vector<16x1xf32>
    %160 = math.rsqrt %159 : vector<16x1xf32>
    %161 = vector.broadcast %160 : vector<16x1xf32> to vector<16x64xf32>
    %162 = arith.mulf %157, %161 : vector<16x64xf32>
    %c0_64 = arith.constant 0 : index
    %c0_65 = arith.constant 0 : index
    %163 = vector.load %arg14[%c0_64, %c0_65] : memref<1x64xf32, #tpu.memory_space<vmem>>, vector<1x64xf32>
    %164 = vector.broadcast %163 : vector<1x64xf32> to vector<16x64xf32>
    %165 = arith.mulf %162, %164 : vector<16x64xf32>
    %c0_66 = arith.constant 0 : index
    %c0_67 = arith.constant 0 : index
    %166 = vector.load %arg15[%c0_66, %c0_67] : memref<1x64xf32, #tpu.memory_space<vmem>>, vector<1x64xf32>
    %167 = vector.broadcast %166 : vector<1x64xf32> to vector<16x64xf32>
    %168 = arith.addf %165, %167 : vector<16x64xf32>
    %cst_68 = arith.constant 5.000000e-01 : f32
    %169 = vector.broadcast %cst_68 : f32 to vector<16x64xf32>
    %170 = arith.mulf %169, %168 : vector<16x64xf32>
    %cst_69 = arith.constant 0.707106769 : f32
    %171 = vector.broadcast %cst_69 : f32 to vector<16x64xf32>
    %172 = arith.mulf %168, %171 : vector<16x64xf32>
    %cst_70 = arith.constant 0.000000e+00 : f32
    %173 = vector.broadcast %cst_70 : f32 to vector<16x64xf32>
    %174 = arith.cmpf oge, %172, %173 : vector<16x64xf32>
    %cst_71 = arith.constant 1.000000e+00 : f32
    %cst_72 = arith.constant -1.000000e+00 : f32
    %175 = vector.broadcast %cst_71 : f32 to vector<16x64xf32>
    %176 = vector.broadcast %cst_72 : f32 to vector<16x64xf32>
    %177 = arith.select %174, %175, %176 : vector<16x64xi1>, vector<16x64xf32>
    %178 = math.absf %172 : vector<16x64xf32>
    %cst_73 = arith.constant 0.327591091 : f32
    %179 = vector.broadcast %cst_73 : f32 to vector<16x64xf32>
    %180 = arith.mulf %179, %178 : vector<16x64xf32>
    %cst_74 = arith.constant 1.000000e+00 : f32
    %181 = vector.broadcast %cst_74 : f32 to vector<16x64xf32>
    %182 = arith.addf %181, %180 : vector<16x64xf32>
    %cst_75 = arith.constant 1.000000e+00 : f32
    %183 = vector.broadcast %cst_75 : f32 to vector<16x64xf32>
    %184 = arith.divf %183, %182 : vector<16x64xf32>
    %cst_76 = arith.constant 1.06140542 : f32
    %185 = vector.broadcast %cst_76 : f32 to vector<16x64xf32>
    %186 = arith.mulf %185, %184 : vector<16x64xf32>
    %cst_77 = arith.constant -1.45315206 : f32
    %187 = vector.broadcast %cst_77 : f32 to vector<16x64xf32>
    %188 = arith.addf %186, %187 : vector<16x64xf32>
    %189 = arith.mulf %188, %184 : vector<16x64xf32>
    %cst_78 = arith.constant 1.42141378 : f32
    %190 = vector.broadcast %cst_78 : f32 to vector<16x64xf32>
    %191 = arith.addf %189, %190 : vector<16x64xf32>
    %192 = arith.mulf %191, %184 : vector<16x64xf32>
    %cst_79 = arith.constant -0.284496725 : f32
    %193 = vector.broadcast %cst_79 : f32 to vector<16x64xf32>
    %194 = arith.addf %192, %193 : vector<16x64xf32>
    %195 = arith.mulf %194, %184 : vector<16x64xf32>
    %cst_80 = arith.constant 0.254829586 : f32
    %196 = vector.broadcast %cst_80 : f32 to vector<16x64xf32>
    %197 = arith.addf %195, %196 : vector<16x64xf32>
    %198 = arith.mulf %197, %184 : vector<16x64xf32>
    %cst_81 = arith.constant 0.000000e+00 : f32
    %199 = vector.broadcast %cst_81 : f32 to vector<16x64xf32>
    %200 = arith.subf %199, %178 : vector<16x64xf32>
    %201 = arith.mulf %200, %178 : vector<16x64xf32>
    %202 = math.exp %201 : vector<16x64xf32>
    %203 = arith.mulf %198, %202 : vector<16x64xf32>
    %cst_82 = arith.constant 1.000000e+00 : f32
    %204 = vector.broadcast %cst_82 : f32 to vector<16x64xf32>
    %205 = arith.subf %204, %203 : vector<16x64xf32>
    %206 = arith.mulf %177, %205 : vector<16x64xf32>
    %cst_83 = arith.constant 1.000000e+00 : f32
    %207 = vector.broadcast %cst_83 : f32 to vector<16x64xf32>
    %208 = arith.addf %207, %206 : vector<16x64xf32>
    %209 = arith.mulf %170, %208 : vector<16x64xf32>
    %210 = arith.truncf %209 : vector<16x64xf32> to vector<16x64xbf16>
    %c0_84 = arith.constant 0 : index
    %c0_85 = arith.constant 0 : index
    %211 = vector.load %arg16[%c0_84, %c0_85] : memref<64x32xbf16, #tpu.memory_space<vmem>>, vector<64x32xbf16>
    %cst_86 = arith.constant dense<0.000000e+00> : vector<16x32xf32>
    %212 = tpu.matmul %210, %211, %cst_86 {dimension_numbers = #tpu.dot_dimension_numbers<[1], [0], [0], [1], [0, 0, 1, 1], [], []>} : vector<16x64xbf16>, vector<64x32xbf16>, vector<16x32xf32> -> vector<16x32xf32>
    %213 = arith.addf %7, %212 : vector<16x32xf32>
    %c0_87 = arith.constant 0 : index
    %c0_88 = arith.constant 0 : index
    %214 = vector.load %arg17[%c0_87, %c0_88] : memref<1x32xf32, #tpu.memory_space<vmem>>, vector<1x32xf32>
    %215 = vector.broadcast %214 : vector<1x32xf32> to vector<16x32xf32>
    %216 = arith.addf %213, %215 : vector<16x32xf32>
    %c0_89 = arith.constant 0 : index
    %c0_90 = arith.constant 0 : index
    %c0_91 = arith.constant 0 : index
    %217 = vector.load %arg18[%c0_89, %c0_90, %c0_91] : memref<1x16x32xf32, #tpu.memory_space<vmem>>, vector<1x16x32xf32>
    %218 = vector.shape_cast %217 : vector<1x16x32xf32> to vector<16x32xf32>
    %219 = vector.shape_cast %216 : vector<16x32xf32> to vector<1x16x32xf32>
    tpu.vector_store %arg18[%c0_89, %c0_90, %c0_91], %219 {strides = array<i32>} : memref<1x16x32xf32, #tpu.memory_space<vmem>>, vector<1x16x32xf32>,
    return
  }
  func.func @transform_0(%arg0: i32, %arg1: i32) -> (i32, i32, i32) {
    %c0_i32 = arith.constant 0 : i32
    %c0_i32_0 = arith.constant 0 : i32
    %c0_i32_1 = arith.constant 0 : i32
    return %arg0, %c0_i32, %c0_i32_0 : i32, i32, i32
  }
  func.func @transform_1(%arg0: i32, %arg1: i32) -> (i32, i32, i32) {
    %c0_i32 = arith.constant 0 : i32
    %c0_i32_0 = arith.constant 0 : i32
    %c0_i32_1 = arith.constant 0 : i32
    return %arg0, %c0_i32, %c0_i32_0 : i32, i32, i32
  }
  func.func @transform_2(%arg0: i32, %arg1: i32) -> (i32, i32, i32) {
    %c0_i32 = arith.constant 0 : i32
    %c0_i32_0 = arith.constant 0 : i32
    %c0_i32_1 = arith.constant 0 : i32
    return %arg0, %c0_i32, %c0_i32_0 : i32, i32, i32
  }
  func.func @transform_3(%arg0: i32, %arg1: i32) -> (i32, i32) {
    %c0_i32 = arith.constant 0 : i32
    %c0_i32_0 = arith.constant 0 : i32
    %c0_i32_1 = arith.constant 0 : i32
    return %c0_i32, %c0_i32_0 : i32, i32
  }
  func.func @transform_4(%arg0: i32, %arg1: i32) -> (i32, i32) {
    %c0_i32 = arith.constant 0 : i32
    %c0_i32_0 = arith.constant 0 : i32
    %c0_i32_1 = arith.constant 0 : i32
    return %c0_i32, %c0_i32_0 : i32, i32
  }
  func.func @transform_5(%arg0: i32, %arg1: i32) -> (i32, i32) {
    %c0_i32 = arith.constant 0 : i32
    %c0_i32_0 = arith.constant 0 : i32
    %c0_i32_1 = arith.constant 0 : i32
    return %c0_i32, %c0_i32_0 : i32, i32
  }
  func.func @transform_6(%arg0: i32, %arg1: i32) -> (i32, i32) {
    %c0_i32 = arith.constant 0 : i32
    %c0_i32_0 = arith.constant 0 : i32
    %c0_i32_1 = arith.constant 0 : i32
    return %c0_i32, %c0_i32_0 : i32, i32
  }
  func.func @transform_7(%arg0: i32, %arg1: i32) -> (i32, i32, i32) {
    %c0_i32 = arith.constant 0 : i32
    %c0_i32_0 = arith.constant 0 : i32
    %c0_i32_1 = arith.constant 0 : i32
    %c0_i32_2 = arith.constant 0 : i32
    return %c0_i32, %c0_i32_0, %c0_i32_1 : i32, i32, i32
  }
  func.func @transform_8(%arg0: i32, %arg1: i32) -> (i32, i32) {
    %c0_i32 = arith.constant 0 : i32
    %c0_i32_0 = arith.constant 0 : i32
    %c0_i32_1 = arith.constant 0 : i32
    return %c0_i32, %c0_i32_0 : i32, i32
  }
  func.func @transform_9(%arg0: i32, %arg1: i32) -> (i32, i32) {
    %c0_i32 = arith.constant 0 : i32
    %c0_i32_0 = arith.constant 0 : i32
    %c0_i32_1 = arith.constant 0 : i32
    return %c0_i32, %c0_i32_0 : i32, i32
  }
  func.func @transform_10(%arg0: i32, %arg1: i32) -> (i32, i32) {
    %c0_i32 = arith.constant 0 : i32
    %c0_i32_0 = arith.constant 0 : i32
    %c0_i32_1 = arith.constant 0 : i32
    return %c0_i32, %c0_i32_0 : i32, i32
  }
  func.func @transform_11(%arg0: i32, %arg1: i32) -> (i32, i32) {
    %c0_i32 = arith.constant 0 : i32
    %c0_i32_0 = arith.constant 0 : i32
    %c0_i32_1 = arith.constant 0 : i32
    return %c0_i32, %c0_i32_0 : i32, i32
  }
  func.func @transform_12(%arg0: i32, %arg1: i32) -> (i32, i32) {
    %c0_i32 = arith.constant 0 : i32
    %c0_i32_0 = arith.constant 0 : i32
    %c0_i32_1 = arith.constant 0 : i32
    return %c0_i32, %c0_i32_0 : i32, i32
  }
  func.func @transform_13(%arg0: i32, %arg1: i32) -> (i32, i32) {
    %c0_i32 = arith.constant 0 : i32
    %c0_i32_0 = arith.constant 0 : i32
    %c0_i32_1 = arith.constant 0 : i32
    return %c0_i32, %c0_i32_0 : i32, i32
  }
  func.func @transform_14(%arg0: i32, %arg1: i32) -> (i32, i32) {
    %c0_i32 = arith.constant 0 : i32
    %c0_i32_0 = arith.constant 0 : i32
    %c0_i32_1 = arith.constant 0 : i32
    return %c0_i32, %c0_i32_0 : i32, i32
  }
  func.func @transform_15(%arg0: i32, %arg1: i32) -> (i32, i32) {
    %c0_i32 = arith.constant 0 : i32
    %c0_i32_0 = arith.constant 0 : i32
    %c0_i32_1 = arith.constant 0 : i32
    return %c0_i32, %c0_i32_0 : i32, i32
  }
  func.func @transform_16(%arg0: i32, %arg1: i32) -> (i32, i32, i32) {
    %c0_i32 = arith.constant 0 : i32
    %c0_i32_0 = arith.constant 0 : i32
    return %arg0, %arg1, %c0_i32 : i32, i32, i32
  }
}

</mosaic_0001>

<bundles_post_ra>
// kernel: tpu_custom_call.1
= control target key start
LH: loop header
LB: loop body
LE: loop exit
PB: predicated region body
PF: predicated region fallthrough
CT: control target
= control target key end

     0   :  { %s4620_s0 = inlined_call_operand.hbm [shape: f32[2,16,32], index: 0, kind: input, shape index: {}]   ;;  %s4621_s1 = inlined_call_operand.hbm [shape: f32[2,16,8], index: 1, kind: input, shape index: {}]   ;;  %s4622_s2 = inlined_call_operand.hbm [shape: f32[2,16,8], index: 2, kind: input, shape index: {}]   ;;  %s4623_s3 = inlined_call_operand.hbm [shape: bf16[32,32], index: 3, kind: input, shape index: {}]   ;;  %s4624_s4 = inlined_call_operand.hbm [shape: f32[1,32], index: 4, kind: input, shape index: {}]   ;;  %s4625_s5 = inlined_call_operand.hbm [shape: bf16[32,64], index: 5, kind: input, shape index: {}]   ;;  %s4626_s6 = inlined_call_operand.hbm [shape: f32[1,64], index: 6, kind: input, shape index: {}]   ;;  %s4627_s7 = inlined_call_operand.hbm [shape: bf16[4,8,32], index: 7, kind: input, shape index: {}]   ;;  %s4628_s8 = inlined_call_operand.hbm [shape: f32[1,32], index: 8, kind: input, shape index: {}]   ;;  %s4629_s9 = inlined_call_operand.hbm [shape: bf16[32,64], index: 9, kind: input, shape index: {}]   ;;  %s4630_s10 = inlined_call_operand.hbm [shape: bf16[32,64], index: 10, kind: input, shape index: {}]   ;;  %s4631_s11 = inlined_call_operand.hbm [shape: f32[1,64], index: 11, kind: input, shape index: {}]   ;;  %s4632_s12 = inlined_call_operand.hbm [shape: f32[1,64], index: 12, kind: input, shape index: {}]   ;;  %s4633_s13 = inlined_call_operand.hbm [shape: f32[1,64], index: 13, kind: input, shape index: {}]   ;;  %s4634_s14 = inlined_call_operand.hbm [shape: bf16[64,32], index: 14, kind: input, shape index: {}]   ;;  %s4635_s15 = inlined_call_operand.hbm [shape: f32[1,32], index: 15, kind: input, shape index: {}]   ;;  %s4636_s16 = inlined_call_operand.hbm [shape: f32[2,16,32], index: 16, kind: output, shape index: {}]  }
   0x1   :  { %4674 = sst [smem:[#allocation46_spill]] %s4620_s0 }
   0x2   :  { %4675 = sst [smem:[#allocation47_spill]] %s4621_s1 }
   0x3   :  { %4676 = sst [smem:[#allocation48_spill]] %s4622_s2 }
   0x4   :  { %4677 = sst [smem:[#allocation49_spill]] %s4623_s3 }
   0x5   :  { %4678 = sst [smem:[#allocation50_spill]] %s4624_s4 }
   0x6   :  { %4679 = sst [smem:[#allocation51_spill]] %s4625_s5 }
   0x7   :  { %4680 = sst [smem:[#allocation52_spill]] %s4626_s6 }
   0x8   :  { %4681 = sst [smem:[#allocation53_spill]] %s4627_s7 }
   0x9   :  { %4682 = sst [smem:[#allocation54_spill]] %s4628_s8 }
   0xa   :  { %4683 = sst [smem:[#allocation55_spill]] %s4629_s9 }
   0xb   :  { %4684 = sst [smem:[#allocation56_spill]] %s4630_s10 }
   0xc   :  { %4685 = sst [smem:[#allocation57_spill]] %s4631_s11 }
   0xd   :  { %4686 = sst [smem:[#allocation58_spill]] %s4632_s12 }
   0xe   :  { %4687 = sst [smem:[#allocation59_spill]] %s4633_s13 }
   0xf   :  { %4688 = sst [smem:[#allocation60_spill]] %s4634_s14 }
  0x10   :  { %4689 = sst [smem:[#allocation61_spill]] %s4635_s15 }
  0x11   :  { %4690 = sst [smem:[#allocation62_spill]] %s4636_s16 }
  0x12   :  { %21 = vsyncpa [#allocation4], 0 }
  0x13   :  { %23 = vsyncpa [#allocation4 + $0x1], 0 }
  0x14   :  { %24 = vsyncpa [#allocation7], 0 }
  0x15   :  { %26 = vsyncpa [#allocation7 + $0x1], 0 }
  0x16   :  { %27 = vsyncpa [#allocation10], 0 }
  0x17   :  { %28 = vsyncpa [#allocation13], 0 }
  0x18   :  { %29 = vsyncpa [#allocation16], 0 }
  0x19   :  { %30 = vsyncpa [#allocation19], 0 }
  0x1a   :  { %31 = vsyncpa [#allocation22], 0 }
  0x1b   :  { %32 = vsyncpa [#allocation25], 0 }
  0x1c   :  { %33 = vsyncpa [#allocation28], 0 }
  0x1d   :  { %34 = vsyncpa [#allocation5], 0 }
  0x1e   :  { %36 = vsyncpa [#allocation5 + $0x1], 0  ;;  %s3717_s21 = smov 0   ;;  %s3719_s22 = smov 0  }
  0x1f   :  { %s3721_s23 = smov 0   ;;  %s3723_s24 = smov 0  }
  0x20   :  { %s3725_s25 = smov 0   ;;  %s3727_s26 = smov 0  }
  0x21 LB: > { %4691 = sst [smem:[#allocation40_spill]] %s3582_s24  ;;  %s3748_s27 = sadd.s32 4294967295, %s3590_s26   ;;  %s3590_s26 = sphi %s3727_s26, %s42_s26   ;;  %s3586_s25 = sphi %s3725_s25, %s4760_s25   ;;  %s3582_s24 = sphi %s3723_s24, %s4759_s24   ;;  %s3578_s23 = sphi %s3721_s23, %s4763_s23   ;;  %s3574_s22 = sphi %s3719_s22, %s4762_s22   ;;  %s3570_s21 = sphi %s3717_s21, %s4761_s21  }
  0x22   : > { %4692 = sst [smem:[#allocation41_spill]] %s3586_s25  ;;  %p2494_p0 = scmp.ge.s32.totalorder %s3590_s26, 1 }
  0x23   : > { %4693 = sst [smem:[#allocation42_spill]] %s3590_s26  ;;  %p4646_p1 = scmp.eq.s32.totalorder %s3748_s27, 0 }
  0x24   : > { %p438_p2 = scmp.lt.s32.totalorder %s3590_s26, 3  ;;  %s3592_s29 = smov [#allocation9]  }
  0x25   : > { %s450_s30 = sshll.u32 %s3592_s29, 4  ;;  %s3593_s17 = smov [#allocation12]   ;;  %s3757_s30 = int_to_ptr.vmem [resolvable:$true] %s450_s30 }
  0x26   : > { %p3753_p3 = pnand %p2494_p0, %p438_p2  ;;  %s474_s18 = sshll.u32 %s3593_s17, 4  ;;  %s3768_s18 = int_to_ptr.vmem [resolvable:$true] %s474_s18 }
  0x27   : > { %s3594_s19 = smov [#allocation15]   ;;  %s4697_s3 = sld [smem:[#allocation49_spill]] }
  0x28   : > { %s4694_s28 = scalar_select %p3753_p3, 1, 0 }
  0x29   : > { %p2798_p4 = pneg %p3753_p3  ;;  %s3770_s20 = sshll.u32 %s3594_s19, 4  ;;  %s499_s20 = int_to_ptr.vmem [resolvable:$true] %s3770_s20 }
  0x2a   : > { %4695 = sst [smem:[#allocation43_spill]] %s4694_s28 }
  0x2b   : > { %p3764_p6 = pnand %p2798_p4, %p4646_p1 }
  0x2d   : > { %s4696_s0 = scalar_select %p3764_p6, 1, 0 }
  0x2e   : > { %s3022_s24 = scalar_lea.hbm %s4697_s3, 256  ;;  %p3780_p8 = pneg %p3764_p6 }
  0x2f   : > { %p3023_p7 = scmp.ne.s32.totalorder %s4697_s3, %s3022_s24  ;;  %p3029_p11 = scmp.lt.u32.totalorder %s3022_s24, %s4697_s3 }
  0x30   : > { %s4698_s15 = scalar_select %p3780_p8, 1, 0 }
  0x31   : > { %p3025_p9 = pnand %p3780_p8, %p3023_p7 }
  0x33   : > { %p3026_p10 = pneg %p3025_p9 }
  0x35   : > { %p3031_p12 = pnand %p3029_p11, %p3026_p10 }
  0x37   : > { %3034 = shalt.err (!%p3031_p12)
}
  0x38   : > { %s3035_s2 = scalar_lea.vmem %s3757_s30, 256  ;;  %p3043_p4 = scmp.lt.s32.totalorder %s3757_s30, %s3757_s30 }
  0x39   : > { %p3036_p13 = scmp.ne.s32.totalorder %s3757_s30, %s3035_s2  ;;  %p3044_p5 = scmp.lt.s32.totalorder %s3035_s2, %s3035_s2 }
  0x3b   : > { %p3038_p0 = pnand %p3036_p13, %p3780_p8  ;;  %p3045_p7 = por %p3044_p5, %p3043_p4 }
  0x3d   : > { %p3039_p2 = pneg %p3038_p0 }
  0x3f   : > { %p3046_p9 = pnand %p3045_p7, %p3039_p2 }
  0x41   : > { %3049 = shalt.err (!%p3046_p9)
}
  0x42   : > { %s4648_s16 = smov 64   ;;  %s4650_s24 = smov 4  }
  0x43   : > { %2801 = dma.hbm_to_vmem [thread:$0]  (!%p3764_p6), %s4697_s3, 256, %s3757_s30, [#allocation10], %s4648_s16, %s4648_s16, %s4650_s24  }
  0x44   : > { %s4699_s5 = sld [smem:[#allocation51_spill]] }
  0x4a   : > { %s3050_s2 = scalar_lea.hbm %s4699_s5, 256 }
  0x4b   : > { %p3051_p5 = scmp.ne.s32.totalorder %s4699_s5, %s3050_s2  ;;  %p3057_p12 = scmp.lt.u32.totalorder %s3050_s2, %s4699_s5 }
  0x4d   : > { %p3053_p10 = pnand %p3051_p5, %p3780_p8 }
  0x4f   : > { %p3054_p11 = pneg %p3053_p10 }
  0x51   : > { %p3059_p13 = pnand %p3057_p12, %p3054_p11 }
  0x53   : > { %3062 = shalt.err (!%p3059_p13)
}
  0x54   : > { %s3063_s30 = scalar_lea.vmem %s3768_s18, 256  ;;  %p3071_p7 = scmp.lt.s32.totalorder %s3768_s18, %s3768_s18 }
  0x55   : > { %p3064_p0 = scmp.ne.s32.totalorder %s3768_s18, %s3063_s30  ;;  %p3072_p9 = scmp.lt.s32.totalorder %s3063_s30, %s3063_s30 }
  0x57   : > { %p3066_p2 = pnand %p3064_p0, %p3780_p8  ;;  %p3073_p5 = por %p3072_p9, %p3071_p7 }
  0x59   : > { %p3067_p4 = pneg %p3066_p2 }
  0x5b   : > { %p3074_p10 = pnand %p3073_p5, %p3067_p4 }
  0x5d   : > { %3077 = shalt.err (!%p3074_p10)
}
  0x5e   : > { %2807 = dma.hbm_to_vmem [thread:$0]  (!%p3764_p6), %s4699_s5, 256, %s3768_s18, [#allocation13], %s4648_s16, %s4648_s16, %s4650_s24  }
  0x5f   : > { %s4700_s7 = sld [smem:[#allocation53_spill]] }
  0x65   : > { %s3078_s28 = scalar_lea.hbm %s4700_s7, 256 }
  0x66   : > { %p3079_p11 = scmp.ne.s32.totalorder %s4700_s7, %s3078_s28  ;;  %p3085_p0 = scmp.lt.u32.totalorder %s3078_s28, %s4700_s7 }
  0x68   : > { %p3081_p12 = pnand %p3079_p11, %p3780_p8 }
  0x6a   : > { %p3082_p13 = pneg %p3081_p12 }
  0x6c   : > { %p3087_p2 = pnand %p3085_p0, %p3082_p13 }
  0x6e   : > { %3090 = shalt.err (!%p3087_p2)
}
  0x6f   : > { %s3091_s30 = scalar_lea.vmem %s499_s20, 256  ;;  %p3099_p5 = scmp.lt.s32.totalorder %s499_s20, %s499_s20 }
  0x70   : > { %p3092_p4 = scmp.ne.s32.totalorder %s499_s20, %s3091_s30  ;;  %p3100_p10 = scmp.lt.s32.totalorder %s3091_s30, %s3091_s30 }
  0x72   : > { %p3094_p7 = pnand %p3092_p4, %p3780_p8  ;;  %p3101_p1 = por %p3100_p10, %p3099_p5 }
  0x74   : > { %p3095_p9 = pneg %p3094_p7 }
  0x76   : > { %p3102_p3 = pnand %p3101_p1, %p3095_p9 }
  0x78   : > { %3105 = shalt.err (!%p3102_p3)
}
  0x79   : > { %2813 = dma.hbm_to_vmem [thread:$0]  (!%p3764_p6), %s4700_s7, 256, %s499_s20, [#allocation16], %s4648_s16, %s4648_s16, %s4650_s24  }
  0x7a   : > { %s3597_s10 = smov [#allocation18]   ;;  %s3598_s14 = smov [#allocation21]  }
  0x7b   : > { %s522_s12 = sshll.u32 %s3597_s10, 4  ;;  %s549_s28 = sshll.u32 %s3598_s14, 4  ;;  %s523_s12 = int_to_ptr.vmem [resolvable:$true] %s522_s12  ;;  %s550_s28 = int_to_ptr.vmem [resolvable:$true] %s549_s28 }
  0x7c   : > { %s4701_s9 = sld [smem:[#allocation55_spill]] }
  0x82   : > { %s3106_s19 = scalar_lea.hbm %s4701_s9, 256 }
  0x83   : > { %p3107_p1 = scmp.ne.s32.totalorder %s4701_s9, %s3106_s19  ;;  %p3113_p12 = scmp.lt.u32.totalorder %s3106_s19, %s4701_s9 }
  0x85   : > { %p3109_p3 = pnand %p3107_p1, %p3780_p8 }
  0x87   : > { %p3110_p11 = pneg %p3109_p3 }
  0x89   : > { %p3115_p13 = pnand %p3113_p12, %p3110_p11 }
  0x8b   : > { %3118 = shalt.err (!%p3115_p13)
}
  0x8c   : > { %s3119_s20 = scalar_lea.vmem %s523_s12, 256  ;;  %p3127_p7 = scmp.lt.s32.totalorder %s523_s12, %s523_s12 }
  0x8d   : > { %p3120_p0 = scmp.ne.s32.totalorder %s523_s12, %s3119_s20  ;;  %p3128_p9 = scmp.lt.s32.totalorder %s3119_s20, %s3119_s20 }
  0x8f   : > { %p3122_p2 = pnand %p3120_p0, %p3780_p8  ;;  %p3129_p5 = por %p3128_p9, %p3127_p7 }
  0x91   : > { %p3123_p4 = pneg %p3122_p2 }
  0x93   : > { %p3130_p10 = pnand %p3129_p5, %p3123_p4 }
  0x95   : > { %3133 = shalt.err (!%p3130_p10)
}
  0x96   : > { %2819 = dma.hbm_to_vmem [thread:$0]  (!%p3764_p6), %s4701_s9, 256, %s523_s12, [#allocation19], %s4648_s16, %s4648_s16, %s4650_s24  }
  0x97   : > { %s4702_s11 = sld [smem:[#allocation57_spill]] }
  0x9d   : > { %s3134_s29 = scalar_lea.hbm %s4702_s11, 16 }
  0x9e   : > { %p3135_p1 = scmp.ne.s32.totalorder %s4702_s11, %s3134_s29  ;;  %p3141_p12 = scmp.lt.u32.totalorder %s3134_s29, %s4702_s11 }
  0xa0   : > { %p3137_p3 = pnand %p3135_p1, %p3780_p8 }
  0xa2   : > { %p3138_p11 = pneg %p3137_p3 }
  0xa4   : > { %p3143_p13 = pnand %p3141_p12, %p3138_p11 }
  0xa6   : > { %3146 = shalt.err (!%p3143_p13)
}
  0xa7   : > { %s3147_s18 = scalar_lea.vmem %s550_s28, 16  ;;  %s3154_s12 = scalar_lea.vmem %s550_s28, 32 }
  0xa8   : > { %p3148_p0 = scmp.ne.s32.totalorder %s550_s28, %s3147_s18  ;;  %p3155_p7 = scmp.lt.s32.totalorder %s550_s28, %s550_s28 }
  0xa9   : > { %p3156_p9 = scmp.lt.s32.totalorder %s3154_s12, %s3147_s18 }
  0xaa   : > { %p3150_p2 = pnand %p3148_p0, %p3780_p8 }
  0xab   : > { %p3157_p5 = por %p3156_p9, %p3155_p7 }
  0xac   : > { %p3151_p4 = pneg %p3150_p2 }
  0xae   : > { %p3158_p10 = pnand %p3157_p5, %p3151_p4 }
  0xb0   : > { %3161 = shalt.err (!%p3158_p10)
}
  0xb1   : > { %2825 = dma.hbm_to_vmem [thread:$0]  (!%p3764_p6), %s4702_s11, 16, %s550_s28, [#allocation22]  }
  0xb2   : > { %s3599_s8 = smov [#allocation24]   ;;  %s4703_s13 = sld [smem:[#allocation59_spill]] }
  0xb3   : > { %s571_s10 = sshll.u32 %s3599_s8, 4  ;;  %s572_s10 = int_to_ptr.vmem [resolvable:$true] %s571_s10 }
  0xb8   : > { %s3162_s17 = scalar_lea.hbm %s4703_s13, 16 }
  0xb9   : > { %p3163_p1 = scmp.ne.s32.totalorder %s4703_s13, %s3162_s17  ;;  %p3169_p12 = scmp.lt.u32.totalorder %s3162_s17, %s4703_s13 }
  0xbb   : > { %p3165_p3 = pnand %p3163_p1, %p3780_p8 }
  0xbd   : > { %p3166_p11 = pneg %p3165_p3 }
  0xbf   : > { %p3171_p13 = pnand %p3169_p12, %p3166_p11 }
  0xc1   : > { %3174 = shalt.err (!%p3171_p13)
}
  0xc2   : > { %s3175_s28 = scalar_lea.vmem %s572_s10, 16  ;;  %s3182_s12 = scalar_lea.vmem %s572_s10, 32 }
  0xc3   : > { %p3176_p0 = scmp.ne.s32.totalorder %s572_s10, %s3175_s28  ;;  %p3183_p7 = scmp.lt.s32.totalorder %s572_s10, %s572_s10 }
  0xc4   : > { %p3184_p9 = scmp.lt.s32.totalorder %s3182_s12, %s3175_s28 }
  0xc5   : > { %p3178_p2 = pnand %p3176_p0, %p3780_p8 }
  0xc6   : > { %p3185_p5 = por %p3184_p9, %p3183_p7 }
  0xc7   : > { %p3179_p4 = pneg %p3178_p2 }
  0xc9   : > { %p3186_p10 = pnand %p3185_p5, %p3179_p4 }
  0xcb   : > { %3189 = shalt.err (!%p3186_p10)
}
  0xcc   : > { %2831 = dma.hbm_to_vmem [thread:$0]  (!%p3764_p6), %s4703_s13, 16, %s572_s10, [#allocation25]  }
  0xcd   : > { %s2493_s8 = sadd.s32 4294967294, %s3590_s26   ;;  %s54_s14 = sadd.s32 1, %s3586_s25 }
  0xce   : > { %p56_p1 = scmp.ge.s32.totalorder %s54_s14, 2  ;;  %s61_s29 = sadd.s32 1, %s3578_s23 }
  0xcf   : > { %p68_p3 = scmp.ne.s32.totalorder %s3578_s23, %s3574_s22  ;;  %p69_p11 = scmp.eq.s32.totalorder %s3590_s26, 0 }
  0xd0   : > { %s4765_s14 = smov (%p56_p1, %s54_s14), 0  ;;  %p74_p13 = scmp.ne.s32.totalorder %s3574_s22, %s3570_s21 }
  0xd1   : > { %4704 = sst [smem:[#allocation44_spill]] %s4765_s14  ;;  %p3917_p12 = por %p69_p11, %p68_p3 }
  0xd2   : > { %s58_s10 = ssub.s32 %s3586_s25, %s4765_s14  ;;  %p425_p0 = scmp.eq.s32.totalorder %s3748_s27, 1 }
  0xd3   : > { %p59_p2 = scmp.eq.s32.totalorder %s58_s10, 0  ;;  %p4706_p4 = scmp.eq.s32.totalorder %s3748_s27, 0 }
  0xd4   : > { %p3932_p9 = por %p425_p0, %p68_p3  ;;  %p431_p5 = scmp.eq.s32.totalorder %s2493_s8, 1 }
  0xd5   : > { %p3928_p7 = por %p4706_p4, %p74_p13  ;;  %p2865_p1 = scmp.lt.s32.totalorder %s3590_s26, 2 }
  0xd6   : > { %s4708_s2 = scalar_select %p3932_p9, 1, 0 }
  0xd7   : > { %s4707_s19 = scalar_select %p3928_p7, 1, 0 }
  0xd8   : > { %s3937_s30 = scalar_select %p59_p2, %s3578_s23, %s61_s29  }
  0xd9   : > { %p3939_p10 = por %p431_p5, %p74_p13  ;;  %s4652_s28 = sand.u32 1, %s3578_s23  }
  0xda   : > { %4709 = sst [smem:[#allocation45_spill]] %s3937_s30  ;;  %s3946_s12 = sshll.u32 %s3586_s25, 8 }
  0xdb   : > { %s4710_s18 = scalar_select %p3939_p10, 1, 0 }
  0xdc   : > { %s3950_s20 = sshll.u32 %s4652_s28, 4  ;;  %p3954_p3 = pnand %p2865_p1, %p3917_p12 }
  0xdd   : > { %s627_s8 = sand.u32 1, %s3590_s26   ;;  %s4712_s1 = sld [smem:[#allocation47_spill]] }
  0xde   : > { %s4711_s3 = scalar_select %p3954_p3, 1, 0 }
  0xdf   : > { %s631_s24 = scalar_lea.vmem [#allocation6], %s3950_s20  ;;  %s3968_s17 = scalar_lea.sflag [#allocation7], %s627_s8 }
  0xe0   : > { %s638_s28 = sshll.u32 %s631_s24, 4  ;;  %p3974_p12 = pneg %p3954_p3  ;;  %s3966_s28 = int_to_ptr.vmem [resolvable:$true] %s638_s28 }
  0xe2   : > { %s4713_s7 = scalar_select %p3974_p12, 1, 0 }
  0xe3   : > { %s3963_s16 = scalar_lea.hbm %s4712_s1, %s3946_s12  ;;  %s3195_s9 = scalar_lea.hbm %s4712_s1, 512 }
  0xe4   : > { %s3190_s5 = scalar_lea.hbm %s3963_s16, 256  ;;  %p3196_p2 = scmp.lt.u32.totalorder %s3963_s16, %s4712_s1 }
  0xe5   : > { %p3191_p11 = scmp.ne.s32.totalorder %s3963_s16, %s3190_s5  ;;  %p3197_p4 = scmp.lt.u32.totalorder %s3195_s9, %s3190_s5 }
  0xe6   : > { %p3199_p1 = scmp.lt.u32.totalorder %s3190_s5, %s3963_s16 }
  0xe7   : > { %p3193_p13 = pnand %p3974_p12, %p3191_p11  ;;  %p3198_p5 = por %p3197_p4, %p3196_p2 }
  0xe9   : > { %p3194_p0 = pneg %p3193_p13  ;;  %p3200_p10 = por %p3199_p1, %p3198_p5 }
  0xeb   : > { %p3201_p9 = pnand %p3200_p10, %p3194_p0 }
  0xed   : > { %3204 = shalt.err (!%p3201_p9)
}
  0xee   : > { %s3205_s8 = scalar_lea.vmem %s3966_s28, 256  ;;  %s3600_s29 = smov [#allocation6]  }
  0xef   : > { %p3206_p11 = scmp.ne.s32.totalorder %s3966_s28, %s3205_s8  ;;  %s3210_s10 = sshll.u32 %s3600_s29, 4  ;;  %s3211_s10 = int_to_ptr.vmem [resolvable:$false] %s3210_s10 }
  0xf0   : > { %s3212_s11 = scalar_lea.vmem %s3211_s10, 512  ;;  %p3213_p6 = scmp.lt.s32.totalorder %s3966_s28, %s3211_s10 }
  0xf1   : > { %p3208_p13 = pnand %p3206_p11, %p3974_p12  ;;  %p3214_p8 = scmp.lt.s32.totalorder %s3212_s11, %s3205_s8 }
  0xf3   : > { %p3209_p7 = pneg %p3208_p13  ;;  %p3215_p2 = por %p3214_p8, %p3213_p6 }
  0xf5   : > { %p3216_p4 = pnand %p3215_p2, %p3209_p7 }
  0xf7   : > { %3219 = shalt.err (!%p3216_p4)
}
  0xf8   : > { %s4667_s5 = smov 128   ;;  %s4669_s9 = smov 8  }
  0xf9   : > { %2844 = dma.hbm_to_vmem [thread:$0]  (!%p3954_p3), %s3963_s16, 256, %s3966_s28, %s3968_s17, %s4667_s5, %s4667_s5, %s4669_s9  }
  0xfa   : > { %s3603_s24 = smov [#allocation11]   ;;  %s3604_s10 = smov [#allocation14]  }
  0xfb   : > { %s464_s29 = sshll.u32 %s3603_s24, 4  ;;  %s488_s8 = sshll.u32 %s3604_s10, 4  ;;  %s465_s29 = int_to_ptr.vmem [resolvable:$true] %s464_s29  ;;  %s489_s8 = int_to_ptr.vmem [resolvable:$true] %s488_s8 }
  0xfc   : > { %s4714_s4 = sld [smem:[#allocation50_spill]]  ;;  %p4715_p8 = scmp.ne.s32.totalorder %s4698_s15, 0 }
 0x102   : > { %s3220_s13 = scalar_lea.hbm %s4714_s4, 16 }
 0x103   : > { %p3221_p6 = scmp.ne.s32.totalorder %s4714_s4, %s3220_s13  ;;  %p3227_p10 = scmp.lt.u32.totalorder %s3220_s13, %s4714_s4 }
 0x105   : > { %p3223_p7 = pnand %p3221_p6, %p4715_p8 }
 0x107   : > { %p3224_p9 = pneg %p3223_p7 }
 0x109   : > { %p3229_p0 = pnand %p3227_p10, %p3224_p9 }
 0x10b   : > { %3232 = shalt.err (!%p3229_p0)
}
 0x10c   : > { %s3233_s16 = scalar_lea.vmem %s465_s29, 16  ;;  %s3240_s1 = scalar_lea.vmem %s465_s29, 32 }
 0x10d   : > { %p3234_p5 = scmp.ne.s32.totalorder %s465_s29, %s3233_s16  ;;  %p3241_p13 = scmp.lt.s32.totalorder %s465_s29, %s465_s29 }
 0x10e   : > { %p3242_p2 = scmp.lt.s32.totalorder %s3240_s1, %s3233_s16 }
 0x10f   : > { %p3236_p1 = pnand %p3234_p5, %p4715_p8 }
 0x110   : > { %p3243_p4 = por %p3242_p2, %p3241_p13 }
 0x111   : > { %p3237_p11 = pneg %p3236_p1 }
 0x113   : > { %p3244_p3 = pnand %p3243_p4, %p3237_p11 }
 0x115   : > { %3247 = shalt.err (!%p3244_p3)
}
 0x116   : > { %p4716_p6 = scmp.ne.s32.totalorder %s4696_s0, 0  ;;  %s4717_s6 = sld [smem:[#allocation52_spill]] }
 0x118   : > { %2804 = dma.hbm_to_vmem [thread:$0]  (!%p4716_p6), %s4714_s4, 16, %s465_s29, [#allocation10]  }
 0x11c   : > { %s3248_s30 = scalar_lea.hbm %s4717_s6, 16 }
 0x11d   : > { %p3249_p7 = scmp.ne.s32.totalorder %s4717_s6, %s3248_s30  ;;  %p3255_p3 = scmp.lt.u32.totalorder %s3248_s30, %s4717_s6 }
 0x11f   : > { %p3251_p9 = pnand %p3249_p7, %p4715_p8 }
 0x121   : > { %p3252_p10 = pneg %p3251_p9 }
 0x123   : > { %p3257_p0 = pnand %p3255_p3, %p3252_p10 }
 0x125   : > { %3260 = shalt.err (!%p3257_p0)
}
 0x126   : > { %s3261_s16 = scalar_lea.vmem %s489_s8, 16  ;;  %s3268_s29 = scalar_lea.vmem %s489_s8, 32 }
 0x127   : > { %p3262_p5 = scmp.ne.s32.totalorder %s489_s8, %s3261_s16  ;;  %p3269_p13 = scmp.lt.s32.totalorder %s489_s8, %s489_s8 }
 0x128   : > { %p3270_p2 = scmp.lt.s32.totalorder %s3268_s29, %s3261_s16 }
 0x129   : > { %p3264_p1 = pnand %p3262_p5, %p4715_p8 }
 0x12a   : > { %p3271_p4 = por %p3270_p2, %p3269_p13 }
 0x12b   : > { %p3265_p11 = pneg %p3264_p1 }
 0x12d   : > { %p3272_p12 = pnand %p3271_p4, %p3265_p11 }
 0x12f   : > { %3275 = shalt.err (!%p3272_p12)
}
 0x130   : > { %2810 = dma.hbm_to_vmem [thread:$0]  (!%p4716_p6), %s4717_s6, 16, %s489_s8, [#allocation13]  }
 0x131   : > { %s3605_s14 = smov [#allocation17]   ;;  %s3606_s26 = smov [#allocation20]  }
 0x132   : > { %s512_s13 = sshll.u32 %s3605_s14, 4  ;;  %s535_s30 = sshll.u32 %s3606_s26, 4  ;;  %s513_s13 = int_to_ptr.vmem [resolvable:$true] %s512_s13  ;;  %s536_s30 = int_to_ptr.vmem [resolvable:$true] %s535_s30 }
 0x133   : > { %s4718_s10 = sld [smem:[#allocation54_spill]] }
 0x139   : > { %s3276_s11 = scalar_lea.hbm %s4718_s10, 16 }
 0x13a   : > { %p3277_p12 = scmp.ne.s32.totalorder %s4718_s10, %s3276_s11  ;;  %p3283_p10 = scmp.lt.u32.totalorder %s3276_s11, %s4718_s10 }
 0x13c   : > { %p3279_p7 = pnand %p3277_p12, %p4715_p8 }
 0x13e   : > { %p3280_p9 = pneg %p3279_p7 }
 0x140   : > { %p3285_p3 = pnand %p3283_p10, %p3280_p9 }
 0x142   : > { %3288 = shalt.err (!%p3285_p3)
}
 0x143   : > { %s3289_s8 = scalar_lea.vmem %s513_s13, 16  ;;  %s3296_s25 = scalar_lea.vmem %s513_s13, 32 }
 0x144   : > { %p3290_p0 = scmp.ne.s32.totalorder %s513_s13, %s3289_s8  ;;  %p3297_p11 = scmp.lt.s32.totalorder %s513_s13, %s513_s13 }
 0x145   : > { %p3298_p13 = scmp.lt.s32.totalorder %s3296_s25, %s3289_s8 }
 0x146   : > { %p3292_p5 = pnand %p3290_p0, %p4715_p8 }
 0x147   : > { %p3299_p2 = por %p3298_p13, %p3297_p11 }
 0x148   : > { %p3293_p1 = pneg %p3292_p5 }
 0x14a   : > { %p3300_p4 = pnand %p3299_p2, %p3293_p1 }
 0x14c   : > { %3303 = shalt.err (!%p3300_p4)
}
 0x14d   : > { %2816 = dma.hbm_to_vmem [thread:$0]  (!%p4716_p6), %s4718_s10, 16, %s513_s13, [#allocation16]  }
 0x14e   : > { %s4719_s24 = sld [smem:[#allocation56_spill]] }
 0x154   : > { %s4720_s11 = smov %s4719_s24  ;;  %s3304_s16 = scalar_lea.hbm %s4719_s24, 256 }
 0x155   : > { %p3305_p12 = scmp.ne.s32.totalorder %s4720_s11, %s3304_s16  ;;  %p3311_p10 = scmp.lt.u32.totalorder %s3304_s16, %s4720_s11 }
 0x157   : > { %p3307_p7 = pnand %p3305_p12, %p4715_p8 }
 0x159   : > { %p3308_p9 = pneg %p3307_p7 }
 0x15b   : > { %p3313_p3 = pnand %p3311_p10, %p3308_p9 }
 0x15d   : > { %3316 = shalt.err (!%p3313_p3)
}
 0x15e   : > { %s3317_s14 = scalar_lea.vmem %s536_s30, 256  ;;  %p3325_p11 = scmp.lt.s32.totalorder %s536_s30, %s536_s30 }
 0x15f   : > { %p3318_p0 = scmp.ne.s32.totalorder %s536_s30, %s3317_s14  ;;  %p3326_p13 = scmp.lt.s32.totalorder %s3317_s14, %s3317_s14 }
 0x161   : > { %p3320_p5 = pnand %p3318_p0, %p4715_p8  ;;  %p3327_p2 = por %p3326_p13, %p3325_p11 }
 0x163   : > { %p3321_p1 = pneg %p3320_p5 }
 0x165   : > { %p3328_p4 = pnand %p3327_p2, %p3321_p1 }
 0x167   : > { %3331 = shalt.err (!%p3328_p4)
}
 0x168   : > { %s4721_s13 = smov 4   ;;  %s4722_s26 = smov 64  }
 0x169   : > { %2822 = dma.hbm_to_vmem [thread:$0]  (!%p4716_p6), %s4720_s11, 256, %s536_s30, [#allocation19], %s4722_s26, %s4722_s26, %s4721_s13  }
 0x16a   : > { %s3607_s24 = smov [#allocation23]   ;;  %s3608_s29 = smov [#allocation26]  }
 0x16b   : > { %s560_s16 = sshll.u32 %s3607_s24, 4  ;;  %s581_s1 = sshll.u32 %s3608_s29, 4  ;;  %s561_s16 = int_to_ptr.vmem [resolvable:$true] %s560_s16  ;;  %s582_s1 = int_to_ptr.vmem [resolvable:$true] %s581_s1 }
 0x16c   : > { %s4723_s14 = sld [smem:[#allocation58_spill]] }
 0x172   : > { %s3332_s9 = scalar_lea.hbm %s4723_s14, 16 }
 0x173   : > { %p3333_p12 = scmp.ne.s32.totalorder %s4723_s14, %s3332_s9  ;;  %p3339_p10 = scmp.lt.u32.totalorder %s3332_s9, %s4723_s14 }
 0x175   : > { %p3335_p7 = pnand %p3333_p12, %p4715_p8 }
 0x177   : > { %p3336_p9 = pneg %p3335_p7 }
 0x179   : > { %p3341_p3 = pnand %p3339_p10, %p3336_p9 }
 0x17b   : > { %3344 = shalt.err (!%p3341_p3)
}
 0x17c   : > { %s3345_s30 = scalar_lea.vmem %s561_s16, 16  ;;  %s3352_s28 = scalar_lea.vmem %s561_s16, 32 }
 0x17d   : > { %p3346_p0 = scmp.ne.s32.totalorder %s561_s16, %s3345_s30  ;;  %p3353_p11 = scmp.lt.s32.totalorder %s561_s16, %s561_s16 }
 0x17e   : > { %p3354_p13 = scmp.lt.s32.totalorder %s3352_s28, %s3345_s30 }
 0x17f   : > { %p3348_p5 = pnand %p3346_p0, %p4715_p8 }
 0x180   : > { %p3355_p2 = por %p3354_p13, %p3353_p11 }
 0x181   : > { %p3349_p1 = pneg %p3348_p5 }
 0x183   : > { %p3356_p4 = pnand %p3355_p2, %p3349_p1 }
 0x185   : > { %3359 = shalt.err (!%p3356_p4)
}
 0x186   : > { %2828 = dma.hbm_to_vmem [thread:$0]  (!%p4716_p6), %s4723_s14, 16, %s561_s16, [#allocation22]  }
 0x187   : > { %s4724_s24 = sld [smem:[#allocation60_spill]] }
 0x18d   : > { %s4725_s29 = smov %s4724_s24  ;;  %s3360_s8 = scalar_lea.hbm %s4724_s24, 512 }
 0x18e   : > { %p3361_p12 = scmp.ne.s32.totalorder %s4725_s29, %s3360_s8  ;;  %p3367_p10 = scmp.lt.u32.totalorder %s3360_s8, %s4725_s29 }
 0x190   : > { %p3363_p7 = pnand %p3361_p12, %p4715_p8 }
 0x192   : > { %p3364_p9 = pneg %p3363_p7 }
 0x194   : > { %p3369_p3 = pnand %p3367_p10, %p3364_p9 }
 0x196   : > { %3372 = shalt.err (!%p3369_p3)
}
 0x197   : > { %s3373_s4 = scalar_lea.vmem %s582_s1, 512  ;;  %p3381_p11 = scmp.lt.s32.totalorder %s582_s1, %s582_s1 }
 0x198   : > { %p3374_p0 = scmp.ne.s32.totalorder %s582_s1, %s3373_s4  ;;  %p3382_p13 = scmp.lt.s32.totalorder %s3373_s4, %s3373_s4 }
 0x19a   : > { %p3376_p5 = pnand %p3374_p0, %p4715_p8  ;;  %p3383_p2 = por %p3382_p13, %p3381_p11 }
 0x19c   : > { %p3377_p1 = pneg %p3376_p5 }
 0x19e   : > { %p3384_p4 = pnand %p3383_p2, %p3377_p1 }
 0x1a0   : > { %3387 = shalt.err (!%p3384_p4)
}
 0x1a1   : > { %2834 = dma.hbm_to_vmem [thread:$0]  (!%p4716_p6), %s4725_s29, 512, %s582_s1, [#allocation25], %s4722_s26, %s4722_s26, %s4721_s13  }
 0x1a2   : > { %s3609_s9 = smov [#allocation27]   ;;  %s4726_s25 = sld [smem:[#allocation61_spill]] }
 0x1a3   : > { %s595_s10 = sshll.u32 %s3609_s9, 4  ;;  %s596_s10 = int_to_ptr.vmem [resolvable:$true] %s595_s10 }
 0x1a8   : > { %s4727_s5 = smov %s4726_s25  ;;  %s3388_s30 = scalar_lea.hbm %s4726_s25, 16 }
 0x1a9   : > { %p3389_p12 = scmp.ne.s32.totalorder %s4727_s5, %s3388_s30  ;;  %p3395_p10 = scmp.lt.u32.totalorder %s3388_s30, %s4727_s5 }
 0x1ab   : > { %p3391_p7 = pnand %p3389_p12, %p4715_p8 }
 0x1ad   : > { %p3392_p9 = pneg %p3391_p7 }
 0x1af   : > { %p3397_p3 = pnand %p3395_p10, %p3392_p9 }
 0x1b1   : > { %3400 = shalt.err (!%p3397_p3)
}
 0x1b2   : > { %s3401_s13 = scalar_lea.vmem %s596_s10, 16  ;;  %s3408_s26 = scalar_lea.vmem %s596_s10, 32 }
 0x1b3   : > { %p3402_p0 = scmp.ne.s32.totalorder %s596_s10, %s3401_s13  ;;  %p3409_p11 = scmp.lt.s32.totalorder %s596_s10, %s596_s10 }
 0x1b4   : > { %p3410_p13 = scmp.lt.s32.totalorder %s3408_s26, %s3401_s13 }
 0x1b5   : > { %p3404_p5 = pnand %p3402_p0, %p4715_p8 }
 0x1b6   : > { %p3411_p2 = por %p3410_p13, %p3409_p11 }
 0x1b7   : > { %p3405_p1 = pneg %p3404_p5 }
 0x1b9   : > { %p3412_p4 = pnand %p3411_p2, %p3405_p1 }
 0x1bb   : > { %3415 = shalt.err (!%p3412_p4)
}
 0x1bc   : > { %2837 = dma.hbm_to_vmem [thread:$0]  (!%p4716_p6), %s4727_s5, 16, %s596_s10, [#allocation28]  }
 0x1bd   : > { %s4728_s14 = sld [smem:[#allocation46_spill]]  ;;  %s610_s9 = scalar_lea.vmem [#allocation3], %s3950_s20 }
 0x1be   : > { %s617_s24 = sshll.u32 %s610_s9, 4  ;;  %s4729_s0 = sand.u32 1, %s3578_s23   ;;  %s4140_s24 = int_to_ptr.vmem [resolvable:$true] %s617_s24 }
 0x1bf   : > { %s4144_s8 = scalar_lea.sflag [#allocation4], %s4729_s0  ;;  %p4730_p12 = scmp.ne.s32.totalorder %s4713_s7, 0 }
 0x1c3   : > { %s4137_s6 = scalar_lea.hbm %s4728_s14, %s3946_s12  ;;  %s3421_s28 = scalar_lea.hbm %s4728_s14, 512 }
 0x1c4   : > { %s3416_s25 = scalar_lea.hbm %s4137_s6, 256  ;;  %p3422_p9 = scmp.lt.u32.totalorder %s4137_s6, %s4728_s14 }
 0x1c5   : > { %p3417_p8 = scmp.ne.s32.totalorder %s4137_s6, %s3416_s25  ;;  %p3423_p10 = scmp.lt.u32.totalorder %s3421_s28, %s3416_s25 }
 0x1c6   : > { %p3425_p0 = scmp.lt.u32.totalorder %s3416_s25, %s4137_s6 }
 0x1c7   : > { %p3419_p6 = pnand %p3417_p8, %p4730_p12  ;;  %p3424_p3 = por %p3423_p10, %p3422_p9 }
 0x1c9   : > { %p3420_p7 = pneg %p3419_p6  ;;  %p3426_p5 = por %p3425_p0, %p3424_p3 }
 0x1cb   : > { %p3427_p1 = pnand %p3426_p5, %p3420_p7 }
 0x1cd   : > { %3430 = shalt.err (!%p3427_p1)
}
 0x1ce   : > { %s3431_s26 = scalar_lea.vmem %s4140_s24, 256  ;;  %s3610_s1 = smov [#allocation3]  }
 0x1cf   : > { %p3432_p11 = scmp.ne.s32.totalorder %s4140_s24, %s3431_s26  ;;  %s3436_s16 = sshll.u32 %s3610_s1, 4  ;;  %s3437_s16 = int_to_ptr.vmem [resolvable:$false] %s3436_s16 }
 0x1d0   : > { %s3438_s11 = scalar_lea.vmem %s3437_s16, 512  ;;  %p3439_p4 = scmp.lt.s32.totalorder %s4140_s24, %s3437_s16 }
 0x1d1   : > { %p3434_p13 = pnand %p3432_p11, %p4730_p12  ;;  %p3440_p8 = scmp.lt.s32.totalorder %s3438_s11, %s3431_s26 }
 0x1d3   : > { %p3435_p2 = pneg %p3434_p13  ;;  %p3441_p6 = por %p3440_p8, %p3439_p4 }
 0x1d5   : > { %p3442_p9 = pnand %p3441_p6, %p3435_p2 }
 0x1d7   : > { %3445 = shalt.err (!%p3442_p9)
}
 0x1d8   : > { %p4731_p7 = scmp.ne.s32.totalorder %s4711_s3, 0  ;;  %s4732_s15 = smov 8  }
 0x1d9   : > { %s4733_s9 = smov 128   ;;  %s4734_s10 = sld [smem:[#allocation48_spill]] }
 0x1da   : > { %2841 = dma.hbm_to_vmem [thread:$0]  (!%p4731_p7), %s4137_s6, 256, %s4140_s24, %s4144_s8, %s4733_s9, %s4733_s9, %s4732_s15  }
 0x1db   : > { %s652_s28 = scalar_lea.vmem [#allocation8], %s3950_s20 }
 0x1dc   : > { %s659_s4 = sshll.u32 %s652_s28, 4  ;;  %s4178_s4 = int_to_ptr.vmem [resolvable:$true] %s659_s4 }
 0x1df   : > { %s4175_s30 = scalar_lea.hbm %s4734_s10, %s3946_s12  ;;  %s3451_s24 = scalar_lea.hbm %s4734_s10, 512 }
 0x1e0   : > { %s3446_s13 = scalar_lea.hbm %s4175_s30, 256  ;;  %p3452_p5 = scmp.lt.u32.totalorder %s4175_s30, %s4734_s10 }
 0x1e1   : > { %p3447_p10 = scmp.ne.s32.totalorder %s4175_s30, %s3446_s13  ;;  %p3453_p1 = scmp.lt.u32.totalorder %s3451_s24, %s3446_s13 }
 0x1e2   : > { %p3455_p13 = scmp.lt.u32.totalorder %s3446_s13, %s4175_s30 }
 0x1e3   : > { %p3449_p3 = pnand %p3447_p10, %p4730_p12  ;;  %p3454_p11 = por %p3453_p1, %p3452_p5 }
 0x1e5   : > { %p3450_p0 = pneg %p3449_p3  ;;  %p3456_p2 = por %p3455_p13, %p3454_p11 }
 0x1e7   : > { %p3457_p4 = pnand %p3456_p2, %p3450_p0 }
 0x1e9   : > { %3460 = shalt.err (!%p3457_p4)
}
 0x1ea   : > { %s3461_s20 = scalar_lea.vmem %s4178_s4, 256  ;;  %s3611_s1 = smov [#allocation8]  }
 0x1eb   : > { %p3462_p8 = scmp.ne.s32.totalorder %s4178_s4, %s3461_s20  ;;  %s3466_s16 = sshll.u32 %s3611_s1, 4  ;;  %s3467_s16 = int_to_ptr.vmem [resolvable:$false] %s3466_s16 }
 0x1ec   : > { %s3468_s11 = scalar_lea.vmem %s3467_s16, 512  ;;  %p3469_p10 = scmp.lt.s32.totalorder %s4178_s4, %s3467_s16 }
 0x1ed   : > { %p3464_p6 = pnand %p3462_p8, %p4730_p12  ;;  %p3470_p3 = scmp.lt.s32.totalorder %s3468_s11, %s3461_s20 }
 0x1ef   : > { %p3465_p9 = pneg %p3464_p6  ;;  %p3471_p5 = por %p3470_p3, %p3469_p10 }
 0x1f1   : > { %p3472_p1 = pnand %p3471_p5, %p3465_p9 }
 0x1f3   : > { %3475 = shalt.err (!%p3472_p1)
}
 0x1f4   : > { %2847 = dma.hbm_to_vmem [thread:$0]  (!%p4731_p7), %s4175_s30, 256, %s4178_s4, %s3968_s17, %s4733_s9, %s4733_s9, %s4732_s15  }
 0x1f5   : > { %s4735_s7 = sld [smem:[#allocation43_spill]] }
 0x1fb   : > { %p4736_p12 = scmp.ne.s32.totalorder %s4735_s7, 0 }
 0x1fc   : > { %s4208_s0 = sand.u32 (!%p4736_p12), 1, %s3574_s22   ;;  %p4737_p0 = scmp.ne.s32.totalorder (!%p4736_p12), %s4707_s19, 0 }
 0x1fd   : > { %671 = sbr.rel (%p4736_p12) target bundleno = 4293 (0x10c5), region = 84  ;;  %s4211_s25 = sshll.u32 (!%p4736_p12), %s4208_s0, 4 }
 0x1fe   : > { %s674_s3 = scalar_lea.sflag (!%p4736_p12), [#allocation4], %s4208_s0  ;;  %s4215_s28 = scalar_lea.vmem (!%p4736_p12), [#allocation3], %s4211_s25 }
 0x204   : > { %3529 = dma.done.wait (%p4737_p0), %s674_s3, 256  }
 0x205   : > { %3531 = vsyncadd (%p4737_p0), %s674_s3, 4294967040  ;;  %s682_s17 = sand.u32 1, %s3748_s27   ;;  %s686_s9 = scalar_lea.vmem [#allocation6], %s4211_s25 }
 0x206   : > { %s683_s15 = scalar_lea.sflag [#allocation7], %s682_s17 }
 0x207   : > { %3533 = dma.done.wait (%p4737_p0), %s683_s15, 512  }
 0x208   : > { %3535 = vsyncadd (%p4737_p0), %s683_s15, 4294966784  ;;  %s695_s30 = scalar_lea.vmem [#allocation8], %s4211_s25  ;;  %p4738_p7 = scmp.eq.s32.totalorder %s3748_s27, 0 }
 0x20a   : > { %3537 = dma.done.wait (%p4738_p7), [#allocation10], 272   ;;  %p4739_p11 = pmov %p4738_p7 }
 0x20b   : > { %p4740_p13 = pmov %p4738_p7 }
 0x20c   : > { %3539 = vsyncadd (%p4739_p11), [#allocation10], 4294967024 }
 0x20d   : > { %3541 = dma.done.wait (%p4740_p13), [#allocation13], 272   ;;  %p4741_p2 = pmov %p4738_p7 }
 0x20f   : > { %3543 = vsyncadd (%p4741_p2), [#allocation13], 4294967024  ;;  %p4742_p4 = pmov %p4741_p2 }
 0x210   : > { %p4743_p8 = pmov %p4741_p2 }
 0x211   : > { %3545 = dma.done.wait (%p4742_p4), [#allocation16], 272  }
 0x212   : > { %3547 = vsyncadd (%p4743_p8), [#allocation16], 4294967024  ;;  %p4744_p6 = pmov %p4741_p2 }
 0x213   : > { %p4745_p9 = pmov %p4741_p2 }
 0x214   : > { %3549 = dma.done.wait (%p4744_p6), [#allocation19], 512  }
 0x215   : > { %3551 = vsyncadd (%p4745_p9), [#allocation19], 4294966784  ;;  %p4746_p10 = pmov %p4741_p2 }
 0x216   : > { %p4747_p3 = pmov %p4741_p2 }
 0x217   : > { %3553 = dma.done.wait (%p4746_p10), [#allocation22], 32  }
 0x218   : > { %3555 = vsyncadd (%p4747_p3), [#allocation22], 4294967264  ;;  %p4748_p5 = pmov %p4741_p2 }
 0x219   : > { %p4749_p1 = pmov %p4741_p2 }
 0x21a   : > { %3557 = dma.done.wait (%p4748_p5), [#allocation25], 528  }
 0x21b   : > { %3559 = vsyncadd (%p4749_p1), [#allocation25], 4294966768  ;;  %p4750_p12 = pmov %p4749_p1 }
 0x21c   : > { %p4751_p0 = pmov %p4749_p1 }
 0x21d   : > { %3561 = dma.done.wait (%p4750_p12), [#allocation28], 16  }
 0x21e   : > { %3563 = vsyncadd (%p4751_p0), [#allocation28], 4294967280  ;;  %v3612_v0 = vmov 0.0   ;;  %vm3613_vm0 = vmmov 0   ;;  %v2964_v1 = vld [vmem:[#allocation12] sm:$0xff]   ;;  %v2965_v2 = vld [vmem:[#allocation12 + $0x8] sm:$0xff]  }
 0x21f   : > { %2622 = vmatprep.subr.bf16.mxu1 %v3612_v0  ;;  %2626 = vmatprep.mubr.msk.bf16.mxu1 %vm3613_vm0, %v3612_v0  ;;  %v812_v3 = vld [vmem:[%s4215_s28] sm:$0xff]  ;;  %v813_v4 = vld [vmem:[%s4215_s28 + $0x8] sm:$0xff]  ;;  %vm838_vm1 = vcmask 261120   ;;  %s3614_s27 = smov 116   ;;  %s3615_s19 = smov 124   ;;  %vm901_vm2 = vcmask 31744  }
 0x220   : > { %2638 = vmatprep.subr.bf16.mxu0 %v3612_v0  ;;  %2640 = vmatprep.mubr.msk.bf16.mxu0 %vm3613_vm0, %v3612_v0  ;;  %v2966_v5 = vld [vmem:[#allocation9] sm:$0xff]   ;;  %v4265_v6 = vpack.c.bf16 %v813_v4, %v812_v3  ;;  %v2967_v7 = vld [vmem:[#allocation9 + $0x8] sm:$0xff]   ;;  %s3616_s4 = smov 108   ;;  %v2540_v19 = vld [vmem:[#allocation11] ss:$0 sm:$0xff]  ;;  %s3617_s13 = smov 100  }
 0x221   : > { %2623 = vmatpush3.bf16.msra.mxu1 %v2964_v1  ;;  %v2536_v8 = vld [vmem:[#allocation14] ss:$0 sm:$0xff]  ;;  %s3618_s26 = smov 4   ;;  %v4312_v23 = vld [vmem:[%s686_s9 + $0x8] sm:$0xff]  ;;  %s3619_s6 = smov 8   ;;  %vm996_vm3 = vcmask 64512  }
 0x222   : > { %2624 = vmatprep.subr.bf16.mxu1 %v3612_v0  ;;  %v4308_v22 = vld [vmem:[%s686_s9] sm:$0xff]  ;;  %s3620_s24 = smov 16   ;;  %s3621_s8 = smov 24   ;;  %v4337_v33 = vld [vmem:[%s695_s30 + $0x8] sm:$0xff]  ;;  %vm999_vm4 = vcmask 130048   ;;  %vm1002_vm5 = vcmask 195584  }
 0x223   : > { %v4328_v24 = vld [vmem:[%s695_s30] sm:$0xff]  ;;  %vm1008_vm6 = vcmask 523264   ;;  %s3622_s12 = smov 120   ;;  %s3623_s20 = smov 96   ;;  %vm1395_vm7 = vcmask 1043456  }
 0x224   : > { %s3624_s1 = smov 88   ;;  %s3625_s16 = smov 112  }
 0x225   : > { %2625 = vmatpush3.bf16.msra.mxu1 %v2965_v2  ;;  %s3626_s11 = smov 80   ;;  %s3627_s7 = smov 104  }
 0x226   : > { %2630 = vmatprep.subr.bf16.mxu1 %v3612_v0  ;;  %s3628_s3 = smov 72   ;;  %s4752_s17 = sld [smem:[#allocation40_spill]] }
 0x227   : > { %s805_s9 = scalar_lea.vmem [#allocation29], %s4211_s25  ;;  %s2220_s25 = scalar_lea.sflag [#allocation5], %s4208_s0 }
 0x228   : > { %2627 = vmatmul.mubr.msk.bf16.vlgmr.msra.gmra.mrb[0].mxu1 %vm838_vm1, %v4265_v6  ;;  %s2235_s30 = sshll.u32 %s805_s9, 4  ;;  %p4754_p11 = scmp.ne.s32.totalorder %s4708_s2, 0  ;;  %s4569_s30 = int_to_ptr.vmem [resolvable:$true] %s2235_s30 }
 0x229   : > { %2631 = vmatpush3.bf16.msra.mxu1 %v2966_v5  ;;  %2634 = vmatprep.mubr.msk.bf16.mxu1 %vm3613_vm0, %v3612_v0 }
 0x22a   : > { %2632 = vmatprep.subr.bf16.mxu1 %v3612_v0 }
 0x22c   : > { %s2580_s15 = sshll.u32 %s4752_s17, 8 }
 0x22d   : > { %2633 = vmatpush3.bf16.msra.mxu1 %v2967_v7 }
 0x22e   : > { %2644 = vmatprep.subr.bf16.mxu1 %v3612_v0 }
 0x230   : > { %2635 = vmatmul.mubr.msk.bf16.vlgmr.msra.gmra.mrb[4].mxu1 %vm838_vm1, %v4265_v6 }
 0x231   : > { %2646 = vmatprep.mubr.msk.bf16.mxu1 %vm3613_vm0, %v3612_v0 }
 0x2fb   : > { %v876_v9 = vpop.f32.mrb[0].mxu1 }
 0x2fc   : > { %v4278_v10 = vadd.f32 %v2536_v8, %v876_v9  ;;  %v2628_v11 = vpop.f32.mrb[1].mxu1 }
 0x2fd   : > { %v879_v12 = vpop.f32.mrb[2].mxu1 }
 0x2fe   : > { %910 = vrot.lane.b32.xlu1 %v4278_v10, %s3614_s27  ;;  %889 = vrot.lane.b32.xlu0 %v4278_v10, %s3615_s19  ;;  %v2629_v13 = vpop.f32.mrb[3].mxu1  ;;  %v4282_v14 = vadd.f32 %v2536_v8, %v879_v12  ;;  %v904_v7 = vmul.f32 %v4308_v22, %v4278_v10 }
 0x302   : > { %940 = vrot.lane.b32.xlu0 %v4278_v10, %s3616_s4  ;;  %912 = vrot.lane.b32.xlu1 %v4282_v14, %s3614_s27 }
 0x303   : > { %v1082_v15 = vpop.f32.mrb[4].mxu1 }
 0x304   : > { %v2636_v16 = vpop.f32.mrb[5].mxu1  ;;  %v4290_v20 = vadd.f32 %v2540_v19, %v1082_v15  ;;  %v905_v15 = vmul.f32 %v4312_v23, %v4282_v14 }
 0x305   : > { %v1085_v17 = vpop.f32.mrb[6].mxu1 }
 0x306   : > { %942 = vrot.lane.b32.xlu1 %v4282_v14, %s3616_s4  ;;  %891 = vrot.lane.b32.xlu0 %v4282_v14, %s3615_s19  ;;  %v2637_v18 = vpop.f32.mrb[7].mxu1  ;;  %v4296_v21 = vadd.f32 %v2540_v19, %v1085_v17 }
 0x30a   : > { %970 = vrot.lane.b32.xlu1 %v4282_v14, %s3617_s13  ;;  %968 = vrot.lane.b32.xlu0 %v4278_v10, %s3617_s13 }
 0x30e   : > { %1091 = vrot.lane.b32.xlu0 %v4290_v20, %s3615_s19  ;;  %1093 = vrot.lane.b32.xlu1 %v4296_v21, %s3615_s19 }
 0x312   : > { %1236 = vrot.lane.b32.xlu0 %v4290_v20, %s3614_s27  ;;  %1238 = vrot.lane.b32.xlu1 %v4296_v21, %s3614_s27 }
 0x316   : > { %895 = vrot.lane.b32.xlu0 %v4278_v10, %s3618_s26  ;;  %897 = vrot.lane.b32.xlu1 %v4282_v14, %s3618_s26 }
 0x31a   : > { %920 = vrot.lane.b32.xlu0 %v4308_v22, %s3619_s6  ;;  %922 = vrot.lane.b32.xlu1 %v4312_v23, %s3619_s6 }
 0x31e   : > { %948 = vrot.lane.b32.xlu0 %v4308_v22, %s3620_s24  ;;  %950 = vrot.lane.b32.xlu1 %v4312_v23, %s3620_s24 }
 0x322   : > { %976 = vrot.lane.b32.xlu0 %v4308_v22, %s3621_s8  ;;  %978 = vrot.lane.b32.xlu1 %v4312_v23, %s3621_s8 }
 0x370   : > { %v911_v25 = vpop.permute.xlu1 %910  ;;  %v890_v26 = vpop.permute.xlu0 %889 }
 0x371   : > { %v916_v27 = vsel %vm901_vm2, %v911_v25, %v890_v26 }
 0x372   : > { %v928_v28 = vmul.f32 %v916_v27, %v4328_v24 }
 0x374   : > { %v941_v29 = vpop.permute.xlu0 %940  ;;  %v913_v30 = vpop.permute.xlu1 %912  ;;  %932 = vrot.lane.b32.xlu0 %v928_v28, %s3619_s6 }
 0x375   : > { %v946_v31 = vsel %vm901_vm2, %v941_v29, %v911_v25 }
 0x376   : > { %v956_v32 = vmul.f32 %v946_v31, %v4328_v24 }
 0x378   : > { %v943_v34 = vpop.permute.xlu1 %942  ;;  %v892_v35 = vpop.permute.xlu0 %891  ;;  %960 = vrot.lane.b32.xlu0 %v956_v32, %s3620_s24 }
 0x379   : > { %v917_v36 = vsel %vm901_vm2, %v913_v30, %v892_v35  ;;  %v947_v38 = vsel %vm901_vm2, %v943_v34, %v913_v30 }
 0x37a   : > { %v929_v37 = vmul.f32 %v917_v36, %v4337_v33  ;;  %v957_v42 = vmul.f32 %v947_v38, %v4337_v33 }
 0x37c   : > { %v971_v39 = vpop.permute.xlu1 %970  ;;  %v969_v40 = vpop.permute.xlu0 %968  ;;  %934 = vrot.lane.b32.xlu1 %v929_v37, %s3619_s6 }
 0x37d   : > { %v974_v41 = vsel %vm901_vm2, %v969_v40, %v941_v29  ;;  %v975_v44 = vsel %vm901_vm2, %v971_v39, %v943_v34 }
 0x37e   : > { %v984_v43 = vmul.f32 %v974_v41, %v4328_v24  ;;  %v985_v47 = vmul.f32 %v975_v44, %v4337_v33 }
 0x380   : > { %988 = vrot.lane.b32.xlu0 %v984_v43, %s3621_s8  ;;  %v4349_v45 = vpop.permute.xlu0 %1091  ;;  %962 = vrot.lane.b32.xlu1 %v957_v42, %s3620_s24  ;;  %v4352_v46 = vpop.permute.xlu1 %1093 }
 0x384   : > { %1246 = vrot.lane.b32.xlu0 %v4308_v22, %s3619_s6  ;;  %v4357_v48 = vpop.permute.xlu0 %1236  ;;  %990 = vrot.lane.b32.xlu1 %v985_v47, %s3621_s8  ;;  %v4360_v49 = vpop.permute.xlu1 %1238 }
 0x385   : > { %v1242_v50 = vsel %vm901_vm2, %v4357_v48, %v4349_v45  ;;  %v1243_v51 = vsel %vm901_vm2, %v4360_v49, %v4352_v46 }
 0x386   : > { %v1254_v52 = vmul.f32 %v1242_v50, %v4328_v24  ;;  %v1255_v53 = vmul.f32 %v1243_v51, %v4337_v33 }
 0x388   : > { %1258 = vrot.lane.b32.xlu0 %v1254_v52, %s3619_s6  ;;  %1248 = vrot.lane.b32.xlu1 %v4312_v23, %s3619_s6  ;;  %v896_v54 = vpop.permute.xlu0 %895  ;;  %v898_v55 = vpop.permute.xlu1 %897 }
 0x389   : > { %v902_v63 = vsel %vm901_vm2, %v890_v26, %v896_v54  ;;  %v903_v1 = vsel %vm901_vm2, %v892_v35, %v898_v55 }
 0x38a   : > { %v906_v4 = vmul.f32 %v902_v63, %v4328_v24  ;;  %v907_v9 = vmul.f32 %v903_v1, %v4337_v33 }
 0x38c   : > { %1097 = vrot.lane.b32.xlu0 %v4290_v20, %s3618_s26  ;;  %1260 = vrot.lane.b32.xlu1 %v1255_v53, %s3619_s6  ;;  %v921_v56 = vpop.permute.xlu0 %920  ;;  %v923_v57 = vpop.permute.xlu1 %922  ;;  %v908_v25 = vadd.f32 %v906_v4, %v904_v7  ;;  %v909_v29 = vadd.f32 %v907_v9, %v905_v15 }
 0x38d   : > { %v926_v5 = vmul.f32 %v921_v56, %v4278_v10  ;;  %v927_v11 = vmul.f32 %v923_v57, %v4282_v14 }
 0x390   : > { %1099 = vrot.lane.b32.xlu1 %v4296_v21, %s3618_s26  ;;  %v949_v58 = vpop.permute.xlu0 %948  ;;  %v951_v59 = vpop.permute.xlu1 %950  ;;  %s3476_s26 = scalar_lea.vmem %s4569_s30, 256 }
 0x391   : > { %v954_v8 = vmul.f32 %v949_v58, %v4278_v10  ;;  %v955_v16 = vmul.f32 %v951_v59, %v4282_v14  ;;  %p3477_p7 = scmp.ne.s32.totalorder %s4569_s30, %s3476_s26 }
 0x393   : > { %p3478_p13 = pnand %p3477_p7, %p4754_p11 }
 0x394   : > { %v977_v60 = vpop.permute.xlu0 %976  ;;  %v979_v62 = vpop.permute.xlu1 %978 }
 0x395   : > { %v982_v12 = vmul.f32 %v977_v60, %v4278_v10  ;;  %v983_v30 = vmul.f32 %v979_v62, %v4282_v14  ;;  %p3479_p2 = pneg %p3478_p13 }
 0x3e6   : > { %v933_v61 = vpop.permute.xlu0 %932 }
 0x3e7   : > { %v938_v13 = vadd.f32 %v933_v61, %v926_v5  ;;  %v1107_v61 = vmul.f32 %v4296_v21, %v4312_v23 }
 0x3e9   : > { %v997_v31 = vsel %vm996_vm3, %v908_v25, %v938_v13 }
 0x3ea   : > { %v961_v2 = vpop.permute.xlu0 %960 }
 0x3eb   : > { %v966_v17 = vadd.f32 %v961_v2, %v954_v8 }
 0x3ed   : > { %v1000_v32 = vsel %vm999_vm4, %v997_v31, %v966_v17 }
 0x3ee   : > { %v935_v3 = vpop.permute.xlu1 %934 }
 0x3ef   : > { %v939_v26 = vadd.f32 %v935_v3, %v927_v11 }
 0x3f1   : > { %v998_v36 = vsel %vm996_vm3, %v909_v29, %v939_v26 }
 0x3f2   : > { %v989_v18 = vpop.permute.xlu0 %988  ;;  %v963_v19 = vpop.permute.xlu1 %962 }
 0x3f3   : > { %v994_v27 = vadd.f32 %v989_v18, %v982_v12  ;;  %v967_v28 = vadd.f32 %v963_v19, %v955_v16 }
 0x3f5   : > { %v1003_v37 = vsel %vm1002_vm5, %v1000_v32, %v994_v27  ;;  %v1001_v39 = vsel %vm999_vm4, %v998_v36, %v967_v28 }
 0x3f6   : > { %v1247_v34 = vpop.permute.xlu0 %1246  ;;  %v991_v35 = vpop.permute.xlu1 %990  ;;  %v1005_v41 = vsel %vm838_vm1, %v1003_v37, %v4278_v10 }
 0x3f7   : > { %v995_v38 = vadd.f32 %v991_v35, %v983_v30  ;;  %v1252_v50 = vmul.f32 %v1247_v34, %v4290_v20 }
 0x3f9   : > { %v1004_v40 = vsel %vm1002_vm5, %v1001_v39, %v995_v38 }
 0x3fa   : > { %v1006_v42 = vsel %vm838_vm1, %v1004_v40, %v4282_v14  ;;  %v1259_v43 = vpop.permute.xlu0 %1258  ;;  %v1249_v44 = vpop.permute.xlu1 %1248 }
 0x3fb   : > { %v1007_v47 = vpack.c.bf16 %v1006_v42, %v1005_v41  ;;  %v1253_v51 = vmul.f32 %v1249_v44, %v4296_v21  ;;  %v1264_v53 = vadd.f32 %v1259_v43, %v1252_v50 }
 0x3fd   : > { %1009 = vst.msk [vmem:[#allocation2] sm:$0xff] %vm1008_vm6, %v1007_v47 }
 0x3fe   : > { %v1261_v52 = vpop.permute.xlu1 %1260  ;;  %v1098_v54 = vpop.permute.xlu0 %1097 }
 0x3ff   : > { %v1265_v55 = vadd.f32 %v1261_v52, %v1253_v51  ;;  %v1104_v10 = vsel %vm901_vm2, %v4349_v45, %v1098_v54 }
 0x400   : > { %v1108_v60 = vmul.f32 %v1104_v10, %v4328_v24 }
 0x401   : > { %v1266_v56 = vpack.c.bf16 %v1265_v55, %v1264_v53 }
 0x402   : > { %v1100_v57 = vpop.permute.xlu1 %1099 }
 0x403   : > { %v1105_v14 = vsel %vm901_vm2, %v4352_v46, %v1100_v57  ;;  %1268 = vrot.lane.b32.xlu1 %v1266_v56, %s3622_s12  ;;  %v1106_v46 = vmul.f32 %v4290_v20, %v4308_v22 }
 0x404   : > { %v1109_v58 = vmul.f32 %v1105_v14, %v4337_v33  ;;  %v4408_v59 = vld [vmem:[#allocation2] sm:$0xff] }
 0x405   : > { %1270 = vrot.lane.b32.xlu0 %v4408_v59, %s3622_s12  ;;  %v1119_v45 = vsel %vm996_vm3, %v4408_v59, 0  ;;  %v1110_v63 = vadd.f32 %v1108_v60, %v1106_v46 }
 0x406   : > { %2639 = vmatpush3.bf16.xpose.msra.mxu0 %v1119_v45  ;;  %v1111_v62 = vadd.f32 %v1109_v58, %v1107_v61 }
 0x407   : > { %2650 = vmatprep.subr.bf16.mxu0 %v3612_v0 }
 0x408   : > { %v1112_v1 = vpack.c.bf16 %v1111_v62, %v1110_v63 }
 0x40d   : > { %2641 = vmatmul.mubr.msk.bf16.vlgmr.msra.gmra.mrb[0].mxu0 %vm996_vm3, %v1112_v1 }
 0x40e   : > { %2652 = vmatprep.mubr.msk.bf16.mxu0 %vm3613_vm0, %v3612_v0 }
 0x475   : > { %v1269_v4 = vpop.permute.xlu1 %1268 }
 0x477   : > { %v1271_v2 = vpop.permute.xlu0 %1270 }
 0x478   : > { %v1276_v3 = vsel %vm996_vm3, %v1271_v2, 0 }
 0x479   : > { %2651 = vmatpush3.bf16.xpose.msra.mxu0 %v1276_v3 }
 0x47a   : > { %2662 = vmatprep.subr.bf16.mxu0 %v3612_v0 }
 0x480   : > { %2653 = vmatmul.mubr.msk.bf16.vlgmr.msra.gmra.mrb[4].mxu0 %vm996_vm3, %v1269_v4 }
 0x481   : > { %2664 = vmatprep.mubr.msk.bf16.mxu0 %vm3613_vm0, %v3612_v0 }
 0x4e0   : > { %v1155_v5 = vpop.f32.mrb[0].mxu0 }
 0x4e1   : > { %v2642_v7 = vpop.f32.mrb[1].mxu0  ;;  %v1163_v8 = vsel %vm999_vm4, %v1155_v5, -inf }
 0x4e2   : > { %1164 = vmax.xlane.f32.xlu0 %v1163_v8  ;;  %v1158_v9 = vpop.f32.mrb[2].mxu0  ;;  %v1391_v7 = vld [vmem:[#allocation15 + $0x4] sm:$0xf] }
 0x4e3   : > { %v2643_v11 = vpop.f32.mrb[3].mxu0  ;;  %v1166_v12 = vsel %vm999_vm4, %v1158_v9, -inf  ;;  %v1397_v8 = vsel %vm1395_vm7, %v1391_v7, 0 }
 0x4e4   : > { %1167 = vmax.xlane.f32.xlu1 %v1166_v12  ;;  %2663 = vmatpush3.bf16.msra.mxu0 %v1397_v8 }
 0x4e5   : > { %2674 = vmatprep.subr.bf16.mxu0 %v3612_v0 }
 0x553   : > { %v1312_v13 = vpop.f32.mrb[4].mxu0 }
 0x554   : > { %v2654_v15 = vpop.f32.mrb[5].mxu0  ;;  %v1319_v16 = vsel %vm999_vm4, %v1312_v13, -inf }
 0x555   : > { %1320 = vmax.xlane.f32.xlu0 %v1319_v16  ;;  %v1315_v17 = vpop.f32.mrb[6].mxu0 }
 0x556   : > { %v2655_v18 = vpop.f32.mrb[7].mxu0  ;;  %v1322_v19 = vsel %vm999_vm4, %v1315_v17, -inf }
 0x559   : > { %1323 = vmax.xlane.f32.xlu0 %v1322_v19 }
 0x56f   : > { %v1165_v25 = vpop.xlane.xlu0 %1164 }
 0x570   : > { %v1169_v26 = vsub.f32 %v1155_v5, %v1165_v25  ;;  %v1235_v5 = vld [vmem:[#allocation15] sm:$0xf] }
 0x571   : > { %v1168_v27 = vpop.xlane.xlu1 %1167 }
 0x572   : > { %v1171_v28 = vmul.f32 1.442695, %v1169_v26  ;;  %v1170_v29 = vsub.f32 %v1158_v9, %v1168_v27 }
 0x574   : > { %2976 = vpow2.f32 %v1171_v28  ;;  %v1173_v30 = vmul.f32 1.442695, %v1170_v29 }
 0x576   : > { %2978 = vpow2.f32 %v1173_v30 }
 0x57e   : > { %v2977_v31 = vpop.eup %2976 }
 0x57f   : > { %v1175_v32 = vsel %vm999_vm4, %v2977_v31, 0.0 }
 0x580   : > { %v2979_v34 = vpop.eup %2978  ;;  %1176 = vadd.xlane.f32.xlu1 %v1175_v32 }
 0x581   : > { %v1178_v35 = vsel %vm999_vm4, %v2979_v34, 0.0 }
 0x582   : > { %1179 = vadd.xlane.f32.xlu0 %v1178_v35 }
 0x5e2   : > { %v1321_v36 = vpop.xlane.xlu0 %1320 }
 0x5e3   : > { %v1325_v37 = vsub.f32 %v1312_v13, %v1321_v36 }
 0x5e5   : > { %v1327_v38 = vmul.f32 1.442695, %v1325_v37 }
 0x5e6   : > { %v1324_v39 = vpop.xlane.xlu0 %1323 }
 0x5e7   : > { %2980 = vpow2.f32 %v1327_v38  ;;  %v1326_v40 = vsub.f32 %v1315_v17, %v1324_v39 }
 0x5e9   : > { %v1329_v41 = vmul.f32 1.442695, %v1326_v40 }
 0x5eb   : > { %2982 = vpow2.f32 %v1329_v41 }
 0x5f1   : > { %v2981_v42 = vpop.eup %2980 }
 0x5f2   : > { %v1331_v43 = vsel %vm999_vm4, %v2981_v42, 0.0 }
 0x5f3   : > { %1332 = vadd.xlane.f32.xlu1 %v1331_v43 }
 0x5f5   : > { %v2983_v44 = vpop.eup %2982 }
 0x5f6   : > { %v1334_v47 = vsel %vm999_vm4, %v2983_v44, 0.0 }
 0x5f7   : > { %1335 = vadd.xlane.f32.xlu0 %v1334_v47 }
 0x604   : > { %1187 = vrot.lane.b32.xlu1 %v4408_v59, %s3623_s20 }
 0x608   : > { %1487 = vrot.lane.b32.xlu1 %v4290_v20, %s3616_s4 }
 0x60c   : > { %1489 = vrot.lane.b32.xlu1 %v4296_v21, %s3616_s4  ;;  %s4753_s4 = sld [smem:[#allocation62_spill]] }
 0x60d   : > { %1342 = vrot.lane.b32.xlu0 %v4408_v59, %s3624_s1  ;;  %v1177_v51 = vpop.xlane.xlu1 %1176 }
 0x60f   : > { %v1180_v50 = vpop.xlane.xlu0 %1179 }
 0x610   : > { %1497 = vrot.lane.b32.xlu1 %v4312_v23, %s3620_s24  ;;  %2984 = vrcp.f32 %v1180_v50 }
 0x611   : > { %1495 = vrot.lane.b32.xlu0 %v4308_v22, %s3620_s24  ;;  %2986 = vrcp.f32 %v1177_v51 }
 0x61a   : > { %v2985_v52 = vpop.eup %2984 }
 0x61b   : > { %v2987_v54 = vpop.eup %2986  ;;  %v1184_v55 = vmul.f32 %v2985_v52, %v2979_v34 }
 0x61c   : > { %v1183_v56 = vmul.f32 %v2987_v54, %v2977_v31 }
 0x61e   : > { %v1185_v14 = vpack.c.bf16 %v1184_v55, %v1183_v56 }
 0x680   : > { %v1333_v53 = vpop.xlane.xlu1 %1332 }
 0x681   : > { %2988 = vrcp.f32 %v1333_v53 }
 0x684   : > { %v1188_v10 = vpop.permute.xlu1 %1187  ;;  %v1336_v57 = vpop.xlane.xlu0 %1335 }
 0x685   : > { %2990 = vrcp.f32 %v1336_v57  ;;  %2645 = vmatpush3.bf16.msra.mxu1 %v1188_v10 }
 0x686   : > { %2656 = vmatprep.subr.bf16.mxu1 %v3612_v0 }
 0x688   : > { %v4446_v58 = vpop.permute.xlu1 %1487  ;;  %2647 = vmatmul.mubr.msk.bf16.vlgmr.msra.gmra.mrb[8].mxu1 %vm999_vm4, %v1185_v14  ;;  %v1343_v60 = vpop.permute.xlu0 %1342 }
 0x689   : > { %v1493_v61 = vsel %vm901_vm2, %v4446_v58, %v4357_v48  ;;  %2657 = vmatpush3.bf16.msra.mxu1 %v1343_v60  ;;  %2658 = vmatprep.mubr.msk.bf16.mxu1 %vm3613_vm0, %v3612_v0 }
 0x68a   : > { %v1503_v45 = vmul.f32 %v1493_v61, %v4328_v24  ;;  %2668 = vmatprep.subr.bf16.mxu1 %v3612_v0 }
 0x68b   : > { %v2989_v62 = vpop.eup %2988 }
 0x68c   : > { %v4456_v46 = vpop.permute.xlu1 %1489  ;;  %1507 = vrot.lane.b32.xlu0 %v1503_v45, %s3620_s24  ;;  %v1339_v2 = vmul.f32 %v2989_v62, %v2981_v42  ;;  %v1496_v9 = vpop.permute.xlu0 %1495 }
 0x68d   : > { %v1494_v63 = vsel %vm901_vm2, %v4456_v46, %v4360_v49  ;;  %v1444_v49 = vsel %vm1395_vm7, %v1235_v5, 0  ;;  %v1501_v13 = vmul.f32 %v1496_v9, %v4290_v20 }
 0x68e   : > { %v1504_v1 = vmul.f32 %v1494_v63, %v4337_v33 }
 0x68f   : > { %v2991_v48 = vpop.eup %2990 }
 0x690   : > { %v1340_v3 = vmul.f32 %v2991_v48, %v2983_v44  ;;  %1509 = vrot.lane.b32.xlu1 %v1504_v1, %s3620_s24  ;;  %1519 = vrot.lane.b32.xlu0 %v4408_v59, %s3625_s16  ;;  %v1498_v11 = vpop.permute.xlu1 %1497 }
 0x691   : > { %v1502_v15 = vmul.f32 %v1498_v11, %v4296_v21 }
 0x692   : > { %v1341_v4 = vpack.c.bf16 %v1340_v3, %v1339_v2 }
 0x694   : > { %2659 = vmatmul.mubr.msk.bf16.vlgmr.msra.gmra.mrb[12].mxu1 %vm999_vm4, %v1341_v4 }
 0x695   : > { %2670 = vmatprep.mubr.msk.bf16.mxu1 %vm3613_vm0, %v3612_v0  ;;  %2669 = vmatpush3.bf16.msra.mxu1 %v1444_v49 }
 0x696   : > { %2680 = vmatprep.subr.bf16.mxu1 %v3612_v0 }
 0x6fe   : > { %v1508_v12 = vpop.permute.xlu0 %1507 }
 0x6ff   : > { %v1513_v17 = vadd.f32 %v1508_v12, %v1501_v13 }
 0x702   : > { %v1510_v16 = vpop.permute.xlu1 %1509  ;;  %v1520_v32 = vpop.permute.xlu0 %1519 }
 0x703   : > { %v1514_v18 = vadd.f32 %v1510_v16, %v1502_v15  ;;  %v1525_v37 = vsel %vm996_vm3, %v1520_v32, 0 }
 0x705   : > { %v1515_v19 = vpack.c.bf16 %v1514_v18, %v1513_v17 }
 0x707   : > { %1517 = vrot.lane.b32.xlu1 %v1515_v19, %s3625_s16 }
 0x75b   : > { %v1227_v25 = vpop.f32.mrb[8].mxu1 }
 0x75c   : > { %v2648_v26 = vpop.f32.mrb[9].mxu1 }
 0x75d   : > { %v1230_v27 = vpop.f32.mrb[10].mxu1 }
 0x75e   : > { %v1234_v28 = vpack.c.bf16 %v1230_v27, %v1227_v25  ;;  %v2649_v29 = vpop.f32.mrb[11].mxu1 }
 0x75f   : > { %v1640_v29 = vld [vmem:[#allocation15 + $0x8] sm:$0xf] }
 0x760   : > { %2671 = vmatmul.mubr.msk.bf16.vlgmr.msra.gmra.mrb[16].mxu1 %vm996_vm3, %v1234_v28 }
 0x761   : > { %2682 = vmatprep.mubr.msk.bf16.mxu1 %vm3613_vm0, %v3612_v0 }
 0x767   : > { %v1382_v30 = vpop.f32.mrb[12].mxu1 }
 0x768   : > { %v2660_v31 = vpop.f32.mrb[13].mxu1 }
 0x769   : > { %v1385_v34 = vpop.f32.mrb[14].mxu1 }
 0x76a   : > { %v1389_v35 = vpack.c.bf16 %v1385_v34, %v1382_v30  ;;  %v2661_v36 = vpop.f32.mrb[15].mxu1  ;;  %v1645_v30 = vsel %vm1395_vm7, %v1640_v29, 0  ;;  %v2563_v29 = vld [vmem:[#allocation21] ss:$0 sm:$0xff] }
 0x76c   : > { %2665 = vmatmul.mubr.msk.bf16.vlgmr.msra.gmra.mrb[8].mxu0 %vm996_vm3, %v1389_v35 }
 0x76d   : > { %2675 = vmatpush3.bf16.xpose.msra.mxu0 %v1525_v37  ;;  %2676 = vmatprep.mubr.msk.bf16.mxu0 %vm3613_vm0, %v3612_v0 }
 0x76e   : > { %2686 = vmatprep.subr.bf16.mxu0 %v3612_v0 }
 0x779   : > { %v1518_v38 = vpop.permute.xlu1 %1517 }
 0x77a   : > { %2677 = vmatmul.mubr.msk.bf16.vlgmr.msra.gmra.mrb[12].mxu0 %vm996_vm3, %v1518_v38 }
 0x77b   : > { %2688 = vmatprep.mubr.msk.bf16.mxu0 %vm3613_vm0, %v3612_v0  ;;  %2687 = vmatpush3.bf16.msra.mxu0 %v1645_v30 }
 0x77c   : > { %2698 = vmatprep.subr.bf16.mxu0 %v3612_v0 }
 0x833   : > { %v1480_v39 = vpop.f32.mrb[16].mxu1 }
 0x834   : > { %v2672_v40 = vpop.f32.mrb[17].mxu1 }
 0x835   : > { %v1483_v41 = vpop.f32.mrb[18].mxu1 }
 0x836   : > { %v2673_v42 = vpop.f32.mrb[19].mxu1 }
 0x83f   : > { %v1433_v43 = vpop.f32.mrb[8].mxu0 }
 0x840   : > { %v4485_v44 = vadd.f32 %v1480_v39, %v1433_v43  ;;  %v2666_v47 = vpop.f32.mrb[9].mxu0 }
 0x841   : > { %v1436_v50 = vpop.f32.mrb[10].mxu0 }
 0x842   : > { %v4487_v51 = vadd.f32 %v1483_v41, %v1436_v50  ;;  %v2667_v52 = vpop.f32.mrb[11].mxu0 }
 0x84d   : > { %v1561_v53 = vpop.f32.mrb[12].mxu0 }
 0x84e   : > { %v2678_v54 = vpop.f32.mrb[13].mxu0  ;;  %v1568_v55 = vsel %vm999_vm4, %v1561_v53, -inf }
 0x84f   : > { %1569 = vmax.xlane.f32.xlu0 %v1568_v55  ;;  %v1564_v56 = vpop.f32.mrb[14].mxu0 }
 0x850   : > { %v2679_v10 = vpop.f32.mrb[15].mxu0  ;;  %v1571_v57 = vsel %vm999_vm4, %v1564_v56, -inf }
 0x851   : > { %1572 = vmax.xlane.f32.xlu1 %v1571_v57 }
 0x862   : > { %1692 = vrot.lane.b32.xlu1 %v4296_v21, %s3617_s13 }
 0x865   : > { %1690 = vrot.lane.b32.xlu0 %v4290_v20, %s3617_s13  ;;  %s4566_s13 = scalar_lea.hbm %s4753_s4, %s2580_s15 }
 0x866   : > { %1700 = vrot.lane.b32.xlu1 %v4312_v23, %s3621_s8 }
 0x869   : > { %1698 = vrot.lane.b32.xlu0 %v4308_v22, %s3621_s8 }
 0x8dc   : > { %v1570_v14 = vpop.xlane.xlu0 %1569 }
 0x8dd   : > { %v1574_v23 = vsub.f32 %v1561_v53, %v1570_v14 }
 0x8de   : > { %v1573_v60 = vpop.xlane.xlu1 %1572 }
 0x8df   : > { %v1576_v22 = vmul.f32 1.442695, %v1574_v23  ;;  %v1575_v2 = vsub.f32 %v1564_v56, %v1573_v60 }
 0x8e0   : > { %v1691_v61 = vpop.permute.xlu0 %1690 }
 0x8e1   : > { %v1696_v45 = vsel %vm901_vm2, %v1691_v61, %v4446_v58  ;;  %2992 = vpow2.f32 %v1576_v22  ;;  %v1578_v3 = vmul.f32 1.442695, %v1575_v2 }
 0x8e2   : > { %v1706_v62 = vmul.f32 %v1696_v45, %v4328_v24  ;;  %v1693_v63 = vpop.permute.xlu1 %1692 }
 0x8e3   : > { %v1697_v1 = vsel %vm901_vm2, %v1693_v63, %v4456_v46  ;;  %2994 = vpow2.f32 %v1578_v3 }
 0x8e4   : > { %v1707_v48 = vmul.f32 %v1697_v1, %v4337_v33  ;;  %1710 = vrot.lane.b32.xlu0 %v1706_v62, %s3621_s8  ;;  %v1699_v33 = vpop.permute.xlu0 %1698  ;;  %v1843_v1 = vld [vmem:[#allocation15 + $0xc] sm:$0xf] }
 0x8e5   : > { %v1704_v7 = vmul.f32 %v1699_v33, %v4290_v20 }
 0x8e6   : > { %1712 = vrot.lane.b32.xlu1 %v1707_v48, %s3621_s8  ;;  %v1701_v46 = vpop.permute.xlu1 %1700  ;;  %v1848_v48 = vsel %vm1395_vm7, %v1843_v1, 0 }
 0x8e7   : > { %v1705_v8 = vmul.f32 %v1701_v46, %v4296_v21 }
 0x8eb   : > { %v2993_v4 = vpop.eup %2992 }
 0x8ec   : > { %v1580_v58 = vsel %vm999_vm4, %v2993_v4, 0.0 }
 0x8ed   : > { %v2995_v24 = vpop.eup %2994 }
 0x8ee   : > { %v1583_v5 = vsel %vm999_vm4, %v2995_v24, 0.0 }
 0x903   : > { %1581 = vadd.xlane.f32.xlu0 %v1580_v58 }
 0x90a   : > { %1584 = vadd.xlane.f32.xlu1 %v1583_v5 }
 0x919   : > { %1591 = vrot.lane.b32.xlu0 %v4408_v59, %s3626_s11 }
 0x91b   : > { %1722 = vrot.lane.b32.xlu1 %v4408_v59, %s3627_s7 }
 0x956   : > { %v1711_v49 = vpop.permute.xlu0 %1710 }
 0x957   : > { %v1716_v11 = vadd.f32 %v1711_v49, %v1704_v7  ;;  %v2968_v49 = vld [vmem:[#allocation18] sm:$0xff]   ;;  %v2969_v7 = vld [vmem:[#allocation20] sm:$0xff]  }
 0x958   : > { %v1713_v9 = vpop.permute.xlu1 %1712 }
 0x959   : > { %v1717_v12 = vadd.f32 %v1713_v9, %v1705_v8  ;;  %v2970_v8 = vld [vmem:[#allocation18 + $0x8] sm:$0xff]   ;;  %v2971_v9 = vld [vmem:[#allocation20 + $0x8] sm:$0xff]  }
 0x95b   : > { %v1718_v13 = vpack.c.bf16 %v1717_v12, %v1716_v11 }
 0x95d   : > { %1720 = vrot.lane.b32.xlu0 %v1718_v13, %s3627_s7 }
 0x990   : > { %v1582_v15 = vpop.xlane.xlu0 %1581 }
 0x991   : > { %2996 = vrcp.f32 %v1582_v15  ;;  %v2556_v15 = vld [vmem:[#allocation17] ss:$0 sm:$0xff] }
 0x994   : > { %v1592_v16 = vpop.permute.xlu0 %1591 }
 0x995   : > { %2681 = vmatpush3.bf16.msra.mxu1 %v1592_v16 }
 0x996   : > { %2692 = vmatprep.subr.bf16.mxu1 %v3612_v0 }
 0x997   : > { %v1585_v17 = vpop.xlane.xlu1 %1584 }
 0x998   : > { %2998 = vrcp.f32 %v1585_v17 }
 0x99b   : > { %v2997_v18 = vpop.eup %2996  ;;  %v1723_v20 = vpop.permute.xlu1 %1722 }
 0x99c   : > { %v1588_v25 = vmul.f32 %v2997_v18, %v2993_v4  ;;  %v1728_v21 = vsel %vm996_vm3, %v1723_v20, 0 }
 0x9a2   : > { %v2999_v19 = vpop.eup %2998 }
 0x9a3   : > { %v1589_v26 = vmul.f32 %v2999_v19, %v2995_v24 }
 0x9a5   : > { %v1590_v27 = vpack.c.bf16 %v1589_v26, %v1588_v25 }
 0x9a7   : > { %2683 = vmatmul.mubr.msk.bf16.vlgmr.msra.gmra.mrb[20].mxu1 %vm999_vm4, %v1590_v27 }
 0x9a8   : > { %2693 = vmatpush3.bf16.xpose.msra.mxu1 %v1728_v21  ;;  %2694 = vmatprep.mubr.msk.bf16.mxu1 %vm3613_vm0, %v3612_v0 }
 0x9a9   : > { %2704 = vmatprep.subr.bf16.mxu1 %v3612_v0 }
 0x9cf   : > { %v1721_v28 = vpop.permute.xlu0 %1720 }
 0x9d0   : > { %2695 = vmatmul.mubr.msk.bf16.vlgmr.msra.gmra.mrb[24].mxu1 %vm996_vm3, %v1721_v28 }
 0x9d1   : > { %2706 = vmatprep.mubr.msk.bf16.mxu1 %vm3613_vm0, %v3612_v0  ;;  %2705 = vmatpush3.bf16.msra.mxu1 %v1848_v48 }
 0x9d2   : > { %2718 = vmatprep.subr.bf16.mxu1 %v3612_v0 }
 0xa7a   : > { %v1631_v31 = vpop.f32.mrb[20].mxu1 }
 0xa7b   : > { %v2684_v32 = vpop.f32.mrb[21].mxu1 }
 0xa7c   : > { %v1634_v34 = vpop.f32.mrb[22].mxu1 }
 0xa7d   : > { %v1638_v35 = vpack.c.bf16 %v1634_v34, %v1631_v31  ;;  %v2685_v36 = vpop.f32.mrb[23].mxu1 }
 0xa7f   : > { %2689 = vmatmul.mubr.msk.bf16.vlgmr.msra.gmra.mrb[16].mxu0 %vm996_vm3, %v1638_v35 }
 0xa80   : > { %2700 = vmatprep.mubr.msk.bf16.mxu0 %vm3613_vm0, %v3612_v0 }
 0xaa3   : > { %v1764_v37 = vpop.f32.mrb[24].mxu1 }
 0xaa4   : > { %v2696_v38 = vpop.f32.mrb[25].mxu1  ;;  %v1771_v39 = vsel %vm999_vm4, %v1764_v37, -inf }
 0xaa5   : > { %1772 = vmax.xlane.f32.xlu1 %v1771_v39  ;;  %v1767_v40 = vpop.f32.mrb[26].mxu1 }
 0xaa6   : > { %v2697_v41 = vpop.f32.mrb[27].mxu1  ;;  %v1774_v42 = vsel %vm999_vm4, %v1767_v40, -inf }
 0xaa7   : > { %1775 = vmax.xlane.f32.xlu0 %v1774_v42 }
 0xb32   : > { %v1773_v43 = vpop.xlane.xlu1 %1772 }
 0xb33   : > { %v1777_v47 = vsub.f32 %v1764_v37, %v1773_v43 }
 0xb34   : > { %v1776_v50 = vpop.xlane.xlu0 %1775 }
 0xb35   : > { %v1779_v52 = vmul.f32 1.442695, %v1777_v47  ;;  %v1778_v53 = vsub.f32 %v1767_v40, %v1776_v50 }
 0xb37   : > { %3000 = vpow2.f32 %v1779_v52  ;;  %v1781_v54 = vmul.f32 1.442695, %v1778_v53 }
 0xb39   : > { %3002 = vpow2.f32 %v1781_v54 }
 0xb41   : > { %v3001_v55 = vpop.eup %3000 }
 0xb42   : > { %v1783_v56 = vsel %vm999_vm4, %v3001_v55, 0.0 }
 0xb43   : > { %v3003_v10 = vpop.eup %3002  ;;  %1784 = vadd.xlane.f32.xlu0 %v1783_v56  ;;  %v2972_v56 = vld [vmem:[#allocation26] sm:$0xff]  }
 0xb44   : > { %v1786_v57 = vsel %vm999_vm4, %v3003_v10, 0.0 }
 0xb45   : > { %1787 = vadd.xlane.f32.xlu1 %v1786_v57  ;;  %v2974_v57 = vld [vmem:[#allocation26 + $0x10] sm:$0xff]  }
 0xb52   : > { %v1681_v14 = vpop.f32.mrb[16].mxu0 }
 0xb53   : > { %v1688_v60 = vadd.f32 %v1681_v14, %v4485_v44  ;;  %v2690_v61 = vpop.f32.mrb[17].mxu0  ;;  %v2975_v14 = vld [vmem:[#allocation26 + $0x18] sm:$0xff]  }
 0xb54   : > { %v1684_v45 = vpop.f32.mrb[18].mxu0 }
 0xb55   : > { %v1689_v62 = vadd.f32 %v1684_v45, %v4487_v51  ;;  %v2691_v63 = vpop.f32.mrb[19].mxu0 }
 0xb59   : > { %1794 = vrot.lane.b32.xlu0 %v4408_v59, %s3628_s3 }
 0xbd0   : > { %v1785_v23 = vpop.xlane.xlu0 %1784 }
 0xbd1   : > { %3004 = vrcp.f32 %v1785_v23  ;;  %v2564_v23 = vld [vmem:[#allocation23] ss:$0 sm:$0xff] }
 0xbd2   : > { %v1788_v22 = vpop.xlane.xlu1 %1787 }
 0xbd3   : > { %3006 = vrcp.f32 %v1788_v22 }
 0xbd4   : > { %v1795_v2 = vpop.permute.xlu0 %1794 }
 0xbd5   : > { %2699 = vmatpush3.bf16.msra.mxu0 %v1795_v2  ;;  %v2565_v2 = vld [vmem:[#allocation24] ss:$0 sm:$0xff] }
 0xbd6   : > { %2710 = vmatprep.subr.bf16.mxu0 %v3612_v0 }
 0xbdb   : > { %v3005_v44 = vpop.eup %3004 }
 0xbdc   : > { %v1791_v3 = vmul.f32 %v3005_v44, %v3001_v55 }
 0xbdd   : > { %v3007_v51 = vpop.eup %3006 }
 0xbde   : > { %v1792_v4 = vmul.f32 %v3007_v51, %v3003_v10  ;;  %v2973_v10 = vld [vmem:[#allocation26 + $0x8] sm:$0xff]  }
 0xbe0   : > { %v1793_v58 = vpack.c.bf16 %v1792_v4, %v1791_v3 }
 0xbe2   : > { %2701 = vmatmul.mubr.msk.bf16.vlgmr.msra.gmra.mrb[20].mxu0 %vm999_vm4, %v1793_v58 }
 0xbe3   : > { %2714 = vmatprep.mubr.msk.bf16.mxu0 %vm3613_vm0, %v3612_v0  ;;  %2711 = vmatpush3.bf16.msra.mxu0 %v2969_v7 }
 0xbe4   : > { %2712 = vmatprep.subr.bf16.mxu0 %v3612_v0 }
 0xbe7   : > { %2713 = vmatpush3.bf16.msra.mxu0 %v2971_v9 }
 0xbe8   : > { %2726 = vmatprep.subr.bf16.mxu0 %v3612_v0 }
 0xcb5   : > { %v1834_v59 = vpop.f32.mrb[20].mxu0 }
 0xcb6   : > { %v2702_v24 = vpop.f32.mrb[21].mxu0 }
 0xcb7   : > { %v1837_v5 = vpop.f32.mrb[22].mxu0 }
 0xcb8   : > { %v1841_v33 = vpack.c.bf16 %v1837_v5, %v1834_v59  ;;  %v2703_v46 = vpop.f32.mrb[23].mxu0 }
 0xcba   : > { %2707 = vmatmul.mubr.msk.bf16.vlgmr.msra.gmra.mrb[28].mxu1 %vm996_vm3, %v1841_v33 }
 0xcbb   : > { %2722 = vmatprep.mubr.msk.bf16.mxu1 %vm3613_vm0, %v3612_v0  ;;  %2719 = vmatpush3.bf16.msra.mxu1 %v2968_v49 }
 0xcbc   : > { %2720 = vmatprep.subr.bf16.mxu1 %v3612_v0 }
 0xcbf   : > { %2721 = vmatpush3.bf16.msra.mxu1 %v2970_v8 }
 0xcc2   : > { %2723 = vmatmul.mubr.msk.bf16.vlgmr.msra.gmra.mrb[32].mxu1 %vm838_vm1, %v4265_v6 }
 0xd8d   : > { %v1884_v11 = vpop.f32.mrb[28].mxu1 }
 0xd8e   : > { %v1891_v12 = vadd.f32 %v1884_v11, %v1688_v60  ;;  %v2708_v13 = vpop.f32.mrb[29].mxu1 }
 0xd8f   : > { %v1887_v16 = vpop.f32.mrb[30].mxu1 }
 0xd90   : > { %v1892_v17 = vadd.f32 %v1887_v16, %v1689_v62  ;;  %v2709_v18 = vpop.f32.mrb[31].mxu1  ;;  %v1900_v19 = vadd.f32 %v2556_v15, %v1891_v12 }
 0xd92   : > { %v1901_v25 = vadd.f32 %v2556_v15, %v1892_v17 }
 0xd94   : > { %v1906_v26 = vpack.c.bf16 %v1901_v25, %v1900_v19 }
 0xd95   : > { %v2013_v20 = vpop.f32.mrb[32].mxu1 }
 0xd96   : > { %2715 = vmatmul.mubr.msk.bf16.vlgmr.msra.gmra.mrb[24].mxu0 %vm838_vm1, %v1906_v26  ;;  %v2724_v27 = vpop.f32.mrb[33].mxu1 }
 0xd97   : > { %2734 = vmatprep.mubr.msk.bf16.mxu0 %vm3613_vm0, %v3612_v0  ;;  %v2016_v6 = vpop.f32.mrb[34].mxu1  ;;  %2727 = vmatpush3.bf16.msra.mxu0 %v2972_v56 }
 0xd98   : > { %v2725_v21 = vpop.f32.mrb[35].mxu1  ;;  %2728 = vmatprep.subr.bf16.mxu0 %v3612_v0 }
 0xd9b   : > { %2729 = vmatpush3.bf16.msra.mxu0 %v2973_v10 }
 0xd9c   : > { %2730 = vmatprep.subr.bf16.mxu0 %v3612_v0 }
 0xd9f   : > { %2731 = vmatpush3.bf16.msra.mxu0 %v2974_v57 }
 0xda0   : > { %2732 = vmatprep.subr.bf16.mxu0 %v3612_v0 }
 0xda3   : > { %2733 = vmatpush3.bf16.msra.mxu0 %v2975_v14 }
 0xe69   : > { %v1960_v28 = vpop.f32.mrb[24].mxu0 }
 0xe6a   : > { %v2014_v30 = vadd.f32 %v2013_v20, %v1960_v28  ;;  %v2716_v31 = vpop.f32.mrb[25].mxu0 }
 0xe6b   : > { %v1963_v32 = vpop.f32.mrb[26].mxu0 }
 0xe6c   : > { %v2017_v34 = vadd.f32 %v2016_v6, %v1963_v32  ;;  %v2717_v35 = vpop.f32.mrb[27].mxu0  ;;  %v2027_v36 = vadd.f32 %v2563_v29, %v2014_v30 }
 0xe6e   : > { %v2030_v37 = vsel %vm1008_vm6, %v2027_v36, 0.0  ;;  %v2028_v38 = vadd.f32 %v2563_v29, %v2017_v34 }
 0xe6f   : > { %2031 = vadd.xlane.f32.xlu1 %v2030_v37 }
 0xe70   : > { %v2033_v39 = vsel %vm1008_vm6, %v2028_v38, 0.0 }
 0xe73   : > { %2034 = vadd.xlane.f32.xlu1 %v2033_v39 }
 0xefc   : > { %v2032_v40 = vpop.xlane.xlu1 %2031 }
 0xefd   : > { %v2037_v41 = vmul.f32 0.015625, %v2032_v40 }
 0xeff   : > { %v2039_v42 = vsub.f32 %v2027_v36, %v2037_v41 }
 0xf00   : > { %v2035_v43 = vpop.xlane.xlu1 %2034 }
 0xf01   : > { %v2038_v47 = vmul.f32 0.015625, %v2035_v43  ;;  %v2041_v50 = vmul.f32 %v2039_v42, %v2039_v42 }
 0xf03   : > { %v2040_v52 = vsub.f32 %v2028_v38, %v2038_v47  ;;  %v2043_v53 = vsel %vm1008_vm6, %v2041_v50, 0.0  ;;  %v3629_v47 = vmov -1.0  }
 0xf04   : > { %2044 = vadd.xlane.f32.xlu1 %v2043_v53 }
 0xf05   : > { %v2042_v54 = vmul.f32 %v2040_v52, %v2040_v52 }
 0xf07   : > { %v2046_v55 = vsel %vm1008_vm6, %v2042_v54, 0.0 }
 0xf08   : > { %2047 = vadd.xlane.f32.xlu1 %v2046_v55 }
 0xf91   : > { %v2045_v60 = vpop.xlane.xlu1 %2044 }
 0xf92   : > { %v2049_v61 = vmul.f32 0.015625, %v2045_v60 }
 0xf94   : > { %v2051_v45 = vadd.f32 1e-05, %v2049_v61 }
 0xf95   : > { %v2048_v62 = vpop.xlane.xlu1 %2047 }
 0xf96   : > { %3008 = vrsqrt.f32 %v2051_v45  ;;  %v2050_v63 = vmul.f32 0.015625, %v2048_v62 }
 0xf98   : > { %v2052_v1 = vadd.f32 1e-05, %v2050_v63 }
 0xf9a   : > { %3010 = vrsqrt.f32 %v2052_v1  ;;  %v2571_v1 = vld [vmem:[#allocation27] ss:$0 sm:$0xff] }
 0xfa0   : > { %v3009_v48 = vpop.eup %3008 }
 0xfa1   : > { %v2055_v22 = vmul.f32 %v3009_v48, %v2039_v42  ;;  %v3020_v48 = vld [vmem:[%s4215_s28] sm:$0xff] }
 0xfa3   : > { %v2064_v44 = vmul.f32 %v2564_v23, %v2055_v22 }
 0xfa4   : > { %v3011_v51 = vpop.eup %3010 }
 0xfa5   : > { %v2073_v3 = vadd.f32 %v2565_v2, %v2064_v44  ;;  %v2056_v4 = vmul.f32 %v3011_v51, %v2040_v52  ;;  %v3021_v51 = vld [vmem:[%s4215_s28 + $0x8] sm:$0xff]  ;;  %s3630_s28 = smov [#allocation29]  }
 0xfa6   : > { %s3480_s24 = sshll.u32 %s3630_s28, 4  ;;  %s3481_s24 = int_to_ptr.vmem [resolvable:$false] %s3480_s24 }
 0xfa7   : > { %v2077_v58 = vmul.f32 0.70710677, %v2073_v3  ;;  %v2065_v59 = vmul.f32 %v2564_v23, %v2056_v4  ;;  %v2075_v57 = vmul.f32 0.5, %v2073_v3  ;;  %s3482_s8 = scalar_lea.vmem %s3481_s24, 512  ;;  %p3483_p4 = scmp.lt.s32.totalorder %s4569_s30, %s3481_s24 }
 0xfa8   : > { %p3484_p8 = scmp.lt.s32.totalorder %s3482_s8, %s3476_s26 }
 0xfa9   : > { %v2083_v0 = vand.u32 2147483647, %v2077_v58  ;;  %v2074_v24 = vadd.f32 %v2565_v2, %v2065_v59  ;;  %vm2079_vm8 = vcmp.ge.f32.partialorder %v2077_v58, 0.0 }
 0xfaa   : > { %v2081_v50 = vsel %vm2079_vm8, 1.0, %v3629_v47  ;;  %p3485_p6 = por %p3484_p8, %p3483_p4 }
 0xfab   : > { %v2085_v5 = vmul.f32 0.3275911, %v2083_v0  ;;  %v2078_v33 = vmul.f32 0.70710677, %v2074_v24  ;;  %v2111_v9 = vsub.f32 0.0, %v2083_v0  ;;  %v2076_v14 = vmul.f32 0.5, %v2074_v24 }
 0xfac   : > { %p3486_p9 = pnand %p3485_p6, %p3479_p2 }
 0xfad   : > { %v2087_v46 = vadd.f32 1.0, %v2085_v5  ;;  %v2084_v49 = vand.u32 2147483647, %v2078_v33  ;;  %v2113_v12 = vmul.f32 %v2111_v9, %v2083_v0  ;;  %vm2080_vm9 = vcmp.ge.f32.partialorder %v2078_v33, 0.0 }
 0xfae   : > { %v2082_v55 = vsel %vm2080_vm9, 1.0, %v3629_v47 }
 0xfaf   : > { %3012 = vrcp.f32 %v2087_v46  ;;  %v2086_v7 = vmul.f32 0.3275911, %v2084_v49  ;;  %v2112_v13 = vsub.f32 0.0, %v2084_v49  ;;  %v2115_v18 = vmul.f32 1.442695, %v2113_v12 }
 0xfb1   : > { %v2088_v8 = vadd.f32 1.0, %v2086_v7  ;;  %v2114_v19 = vmul.f32 %v2112_v13, %v2084_v49 }
 0xfb3   : > { %3014 = vrcp.f32 %v2088_v8  ;;  %v2117_v6 = vmul.f32 1.442695, %v2114_v19 }
 0xfb4   : > { %3016 = vpow2.f32 %v2115_v18 }
 0xfb5   : > { %3018 = vpow2.f32 %v2117_v6 }
 0xfb9   : > { %v3013_v11 = vpop.eup %3012 }
 0xfba   : > { %v2093_v15 = vmul.f32 1.0614054, %v3013_v11 }
 0xfbc   : > { %v2095_v16 = vadd.f32 -1.4531521, %v2093_v15 }
 0xfbd   : > { %v3015_v17 = vpop.eup %3014 }
 0xfbe   : > { %v2094_v25 = vmul.f32 1.0614054, %v3015_v17  ;;  %v2097_v26 = vmul.f32 %v3013_v11, %v2095_v16  ;;  %v3017_v38 = vpop.eup %3016 }
 0xfbf   : > { %v3019_v43 = vpop.eup %3018 }
 0xfc0   : > { %v2096_v20 = vadd.f32 -1.4531521, %v2094_v25  ;;  %v2099_v27 = vadd.f32 1.4214138, %v2097_v26 }
 0xfc2   : > { %v2098_v21 = vmul.f32 %v3015_v17, %v2096_v20  ;;  %v2101_v28 = vmul.f32 %v3013_v11, %v2099_v27 }
 0xfc4   : > { %v2100_v29 = vadd.f32 1.4214138, %v2098_v21  ;;  %v2103_v30 = vadd.f32 -0.28449672, %v2101_v28 }
 0xfc6   : > { %v2102_v31 = vmul.f32 %v3015_v17, %v2100_v29  ;;  %v2105_v32 = vmul.f32 %v3013_v11, %v2103_v30 }
 0xfc8   : > { %v2104_v34 = vadd.f32 -0.28449672, %v2102_v31  ;;  %v2107_v35 = vadd.f32 0.2548296, %v2105_v32 }
 0xfca   : > { %v2106_v36 = vmul.f32 %v3015_v17, %v2104_v34  ;;  %v2109_v37 = vmul.f32 %v3013_v11, %v2107_v35 }
 0xfcc   : > { %v2108_v39 = vadd.f32 0.2548296, %v2106_v36  ;;  %v2119_v40 = vmul.f32 %v3017_v38, %v2109_v37 }
 0xfce   : > { %v2110_v41 = vmul.f32 %v3015_v17, %v2108_v39  ;;  %v2121_v42 = vsub.f32 1.0, %v2119_v40 }
 0xfd0   : > { %v2120_v52 = vmul.f32 %v3019_v43, %v2110_v41  ;;  %v2123_v53 = vmul.f32 %v2121_v42, %v2081_v50 }
 0xfd2   : > { %v2122_v54 = vsub.f32 1.0, %v2120_v52  ;;  %v2125_v10 = vadd.f32 1.0, %v2123_v53 }
 0xfd4   : > { %v2124_v56 = vmul.f32 %v2122_v54, %v2082_v55  ;;  %v2127_v61 = vmul.f32 %v2125_v10, %v2075_v57 }
 0xfd6   : > { %v2126_v60 = vadd.f32 1.0, %v2124_v56 }
 0xfd8   : > { %v2128_v45 = vmul.f32 %v2126_v60, %v2076_v14 }
 0xfda   : > { %v2129_v62 = vpack.c.bf16 %v2128_v45, %v2127_v61 }
 0xfdc   : > { %2735 = vmatmul.mubr.msk.bf16.vlgmr.msra.gmra.mrb[28].mxu0 %vm1008_vm6, %v2129_v62 }
0x10af   : > { %v2199_v63 = vpop.f32.mrb[28].mxu0 }
0x10b0   : > { %v2206_v23 = vadd.f32 %v3020_v48, %v2199_v63  ;;  %v2736_v22 = vpop.f32.mrb[29].mxu0 }
0x10b1   : > { %v2202_v2 = vpop.f32.mrb[30].mxu0 }
0x10b2   : > { %v2215_v44 = vadd.f32 %v2571_v1, %v2206_v23  ;;  %v2207_v3 = vadd.f32 %v3021_v51, %v2202_v2  ;;  %v2737_v4 = vpop.f32.mrb[31].mxu0 }
0x10b4   : > { %2217 = vst.msk [vmem:[%s805_s9] sm:$0xff] %vm838_vm1, %v2215_v44  ;;  %v2216_v58 = vadd.f32 %v2571_v1, %v2207_v3 }
0x10b6   : > { %2218 = vst.msk [vmem:[%s805_s9 + $0x8] sm:$0xff] %vm838_vm1, %v2216_v58 }
0x10b7   : > { %3489 = shalt.err (!%p3486_p9)
}
0x10b8   : > { %s3490_s12 = scalar_lea.hbm %s4566_s13, 256  ;;  %s3494_s16 = scalar_lea.hbm %s4753_s4, 512 }
0x10b9   : > { %p3491_p10 = scmp.ne.s32.totalorder %s4566_s13, %s3490_s12  ;;  %p3495_p1 = scmp.lt.u32.totalorder %s4566_s13, %s4753_s4 }
0x10ba   : > { %p3496_p12 = scmp.lt.u32.totalorder %s3494_s16, %s3490_s12  ;;  %p3498_p7 = scmp.lt.u32.totalorder %s3490_s12, %s4566_s13 }
0x10bb   : > { %p3492_p3 = pnand %p3491_p10, %p4754_p11 }
0x10bc   : > { %p3497_p0 = por %p3496_p12, %p3495_p1 }
0x10bd   : > { %p3493_p5 = pneg %p3492_p3 }
0x10be   : > { %p3499_p13 = por %p3498_p7, %p3497_p0 }
0x10c0   : > { %p3500_p2 = pnand %p3499_p13, %p3493_p5 }
0x10c2   : > { %3503 = shalt.err (!%p3500_p2)
}
0x10c3   : > { %s3631_s3 = smov 128  }
0x10c4   : > { %2796 = dma.vmem_to_hbm [thread:$0]  (%p4754_p11), %s4569_s30, 256, %s4566_s13, %s2220_s25, %s3631_s3, %s3631_s3, %s3619_s6  }
0x10c5 PF: > { %s4755_s17 = sld [smem:[#allocation42_spill]]  ;;  %s2250_s15 = sand.u32 1, %s3570_s21  }
0x10c6   : > { %p4756_p4 = scmp.ne.s32.totalorder %s4710_s18, 0  ;;  %s2251_s9 = scalar_lea.sflag [#allocation5], %s2250_s15 }
0x10cb   : > { %p4757_p8 = scmp.ge.s32.totalorder %s4755_s17, 2 }
0x10cd   : > { %p2849_p6 = pnand %p4757_p8, %p4756_p4 }
0x10cf   : > { %3565 = dma.done.wait (!%p2849_p6), %s2251_s9, 256  }
0x10d0   : > { %3567 = vsyncadd (!%p2849_p6), %s2251_s9, 4294967040  ;;  %s42_s26 = sadd.s32 1, %s4755_s17   ;;  %s4758_s2 = sld [smem:[#allocation45_spill]] }
0x10d1   : > { %p39_p9 = scmp.ge.s32.totalorder %s42_s26, 4   ;;  %s4759_s24 = sld [smem:[#allocation41_spill]] }
0x10d2   : > { %s4760_s25 = sld [smem:[#allocation44_spill]]  ;;  %s4761_s21 = smov %s3574_s22 }
0x10d3   : > { %s4762_s22 = smov %s3578_s23  ;;  %41 = sbr.rel (!%p39_p9) target bundleno = 33 (0x21), region = 215 }
0x10d6   : > { %s4763_s23 = smov %s4758_s2 }
0x10da   :  { %2256 = vsyncpa [#allocation4], 1 }
0x10db   :  { %2258 = vsyncpa [#allocation4 + $0x1], 1 }
0x10dc   :  { %2259 = vsyncpa [#allocation7], 1 }
0x10dd   :  { %2261 = vsyncpa [#allocation7 + $0x1], 1 }
0x10de   :  { %2262 = vsyncpa [#allocation10], 1 }
0x10df   :  { %2263 = vsyncpa [#allocation13], 1 }
0x10e0   :  { %2264 = vsyncpa [#allocation16], 1 }
0x10e1   :  { %2265 = vsyncpa [#allocation19], 1 }
0x10e2   :  { %2266 = vsyncpa [#allocation22], 1 }
0x10e3   :  { %2267 = vsyncpa [#allocation25], 1 }
0x10e4   :  { %2268 = vsyncpa [#allocation28], 1 }
0x10e5   :  { %2269 = vsyncpa [#allocation5], 1 }
0x10e6   :  { %2271 = vsyncpa [#allocation5 + $0x1], 1 }

</bundles_post_ra>
